<compile_context>
chip_gen: v5e
topology: v5e:2x2
jax: 0.10.0
libtpu: 0.0.40
codegen_flags: <defaults>
</compile_context>

<pallas_src>
from functools import partial

import jax
import jax.numpy as jnp
from jax.experimental import pallas as pl
from jax.experimental.pallas import tpu as pltpu

# ---------------- small synthetic Molmo config ----------------
SEQ = 8
HIDDEN = 64
N_HEADS = 4
HEAD_DIM = HIDDEN // N_HEADS            # 16
N_KV_HEADS = 2
GROUP = N_HEADS // N_KV_HEADS           # 2
Q_SIZE = N_HEADS * HEAD_DIM             # 64
KV_SIZE = N_KV_HEADS * HEAD_DIM         # 32
INTERMEDIATE = 128                      # config.intermediate_size
FFN = INTERMEDIATE // 2                 # MolmoMLP: intermediate_size // 2
N_LAYERS = 2
EPS = 1e-6
ROPE_THETA = 10000.0
EMBEDDING_SIZE = 256
ADDITIONAL_VOCAB_SIZE = 128
VOCAB = EMBEDDING_SIZE + ADDITIONAL_VOCAB_SIZE
SCALE = HEAD_DIM ** -0.5
NEG_INF = -1e30


# ---------------- shared math ----------------
def _rmsnorm(x, w, eps=EPS):
    var = jnp.mean(x * x, axis=-1, keepdims=True)
    return (x * jax.lax.rsqrt(var + eps)) * w


def _mxu(a, w_bf16):
    """bf16 operands, f32 accumulation: native MXU path on v5e/v6e/v7x."""
    return jnp.dot(a.astype(jnp.bfloat16), w_bf16,
                   preferred_element_type=jnp.float32)


# ---------------- fused whole-model Pallas kernel ----------------
def fused_model_kernel(
        # constants (same block every grid step)
        hid_in_ref, bias_ref, cosq_ref, sinq_ref, cosk_ref, sink_ref,
        pq_ref, pk_ref, fnorm_ref,
        # per-layer stacked params (block l streamed per grid step)
        ln1_ref, wq_ref, bq_ref, wk_ref, bk_ref, wv_ref, bv_ref,
        qn_ref, kn_ref, wo_ref, ln2_ref, wg_ref, wu_ref, wd_ref,
        # output + VMEM-resident activations
        out_ref, h_s, r_s):
    l = pl.program_id(0)

    @pl.when(l == 0)
    def _():
        # residual=None first-layer path: residual <- hidden via resid = 0.
        h_s[...] = hid_in_ref[...]
        r_s[...] = jnp.zeros_like(r_s)

    # ---- input_layernorm (fused add + RMSNorm), f32 ----
    x = h_s[...] + r_s[...]
    res1 = x
    h = _rmsnorm(x, ln1_ref[0])

    # ---- MolmoAttention: qkv_proj (pre-split slabs, lane aligned) ----
    hb = h.astype(jnp.bfloat16)
    q = jnp.dot(hb, wq_ref[0], preferred_element_type=jnp.float32) + bq_ref[0]
    k = jnp.dot(hb, wk_ref[0], preferred_element_type=jnp.float32) + bk_ref[0]
    v = jnp.dot(hb, wv_ref[0], preferred_element_type=jnp.float32) + bv_ref[0]

    # attention_layer_norm=True: q_norm over hidden_size, k_norm over kv_size.
    q = _rmsnorm(q, qn_ref[0])
    k = _rmsnorm(k, kn_ref[0])

    # ---- neox RoPE on full-width q/k: rotate-half == signed permutation matmul ----
    q = q * cosq_ref[...] + _mxu(q, pq_ref[...]) * sinq_ref[...]
    k = k * cosk_ref[...] + _mxu(k, pk_ref[...]) * sink_ref[...]

    # ---- causal GQA attention: all heads in ONE pair of matmuls ----
    q_stack = jnp.concatenate(
        [q[:, hh * HEAD_DIM:(hh + 1) * HEAD_DIM] for hh in range(N_HEADS)],
        axis=0)                                                # [NH*T, HD]
    k_stack = jnp.concatenate(
        [k[:, g * HEAD_DIM:(g + 1) * HEAD_DIM] for g in range(N_KV_HEADS)],
        axis=0)                                                # [NKV*T, HD]
    v_stack = jnp.concatenate(
        [v[:, g * HEAD_DIM:(g + 1) * HEAD_DIM] for g in range(N_KV_HEADS)],
        axis=0)                                                # [NKV*T, HD]

    s = jax.lax.dot_general(
        q_stack.astype(jnp.bfloat16), k_stack.astype(jnp.bfloat16),
        (((1,), (1,)), ((), ())),
        preferred_element_type=jnp.float32) * SCALE            # [NH*T, NKV*T]
    s = s + bias_ref[...]          # causal + head->kv-group mask (precomputed)
    s = s - jnp.max(s, axis=-1, keepdims=True)
    p = jnp.exp(s)
    p = p * pl.reciprocal(jnp.sum(p, axis=-1, keepdims=True), approx=True)
    o_stack = jnp.dot(p.astype(jnp.bfloat16), v_stack.astype(jnp.bfloat16),
                      preferred_element_type=jnp.float32)      # [NH*T, HD]
    attn = jnp.concatenate(
        [o_stack[hh * SEQ:(hh + 1) * SEQ, :] for hh in range(N_HEADS)],
        axis=-1)                                               # [T, Q_SIZE]
    attn_out = _mxu(attn, wo_ref[0])                           # o_proj

    # ---- post_attention_layernorm (fused add + RMSNorm) ----
    x2 = attn_out + res1
    res2 = x2
    h2 = _rmsnorm(x2, ln2_ref[0])

    # ---- MolmoMLP: SwiGLU with pre-split gate/up slabs ----
    h2b = h2.astype(jnp.bfloat16)
    gate = jnp.dot(h2b, wg_ref[0], preferred_element_type=jnp.float32)
    up = jnp.dot(h2b, wu_ref[0], preferred_element_type=jnp.float32)
    act = gate * pl.reciprocal(1.0 + jnp.exp(-gate), approx=True) * up
    mlp_out = _mxu(act, wd_ref[0])

    # carry (hidden, residual) to the next layer in VMEM
    h_s[...] = mlp_out
    r_s[...] = res2

    # ---- final `self.norm` folded into the last grid step ----
    @pl.when(l == pl.num_programs(0) - 1)
    def _():
        out_ref[...] = _rmsnorm(mlp_out + res2, fnorm_ref[...])


# ---------------- wrapper (precomputed tables + pallas_call) ----------------
def _rope_tables_full(positions):
    """cos/sin tiled to full q / k width (per-head period)."""
    inv_freq = 1.0 / (ROPE_THETA ** (
        jnp.arange(0, HEAD_DIM, 2, dtype=jnp.float32) / HEAD_DIM))
    freqs = positions.astype(jnp.float32)[:, None] * inv_freq[None, :]  # [T, HD/2]
    cos_h = jnp.concatenate([jnp.cos(freqs), jnp.cos(freqs)], axis=-1)  # [T, HD]
    sin_h = jnp.concatenate([jnp.sin(freqs), jnp.sin(freqs)], axis=-1)
    return (jnp.tile(cos_h, (1, N_HEADS)), jnp.tile(sin_h, (1, N_HEADS)),
            jnp.tile(cos_h, (1, N_KV_HEADS)), jnp.tile(sin_h, (1, N_KV_HEADS)))


def _halfswap_perm(width):
    """Signed permutation P s.t. (x @ P) == per-head neox rotate_half(x)."""
    half = HEAD_DIM // 2
    src = jnp.arange(width)
    dst = jnp.arange(width)
    dm = dst % HEAD_DIM
    src_of_dst = jnp.where(dm < half, dst + half, dst - half)
    sign = jnp.where(dm < half, -1.0, 1.0).astype(jnp.float32)
    return (src[:, None] == src_of_dst[None, :]).astype(jnp.float32) * sign[None, :]


def _attn_bias():
    """[N_HEADS*T, N_KV_HEADS*T] additive mask: causal + head->kv-group."""
    rows = jnp.arange(N_HEADS * SEQ)
    cols = jnp.arange(N_KV_HEADS * SEQ)
    h_idx, t_idx = rows // SEQ, rows % SEQ
    g_idx, s_idx = cols // SEQ, cols % SEQ
    valid = ((g_idx[None, :] == (h_idx[:, None] // GROUP)) &
             (s_idx[None, :] <= t_idx[:, None]))
    return jnp.where(valid, 0.0, NEG_INF).astype(jnp.float32)


def _const_spec(arr):
    return pl.BlockSpec(arr.shape, lambda l, _nd=arr.ndim: (0,) * _nd)


def _layer_spec(arr):
    return pl.BlockSpec((1,) + arr.shape[1:], lambda l: (l, 0, 0))


def molmo_model_forward(input_ids, positions, params):
    hidden = jnp.take(params["embed"], input_ids, axis=0)
    cos_q, sin_q, cos_k, sin_k = _rope_tables_full(positions)
    bias = _attn_bias()
    p_q = _halfswap_perm(Q_SIZE).astype(jnp.bfloat16)
    p_k = _halfswap_perm(KV_SIZE).astype(jnp.bfloat16)

    lp = params["layers"]
    bf = lambda a: a.astype(jnp.bfloat16)   # MXU weights in bf16

    const_inputs = (hidden, bias, cos_q, sin_q, cos_k, sin_k, p_q, p_k,
                    params["final_norm"])
    layer_inputs = (lp["ln1"], bf(lp["w_q"]), lp["b_q"], bf(lp["w_k"]),
                    lp["b_k"], bf(lp["w_v"]), lp["b_v"], lp["q_norm"],
                    lp["k_norm"], bf(lp["w_o"]), lp["ln2"], bf(lp["w_gate"]),
                    bf(lp["w_up"]), bf(lp["w_down"]))

    in_specs = ([_const_spec(a) for a in const_inputs] +
                [_layer_spec(a) for a in layer_inputs])

    return pl.pallas_call(
        fused_model_kernel,
        grid=(N_LAYERS,),
        in_specs=in_specs,
        out_specs=pl.BlockSpec((SEQ, HIDDEN), lambda l: (0, 0)),
        out_shape=jax.ShapeDtypeStruct((SEQ, HIDDEN), jnp.float32),
        scratch_shapes=[pltpu.VMEM((SEQ, HIDDEN), jnp.float32),
                        pltpu.VMEM((SEQ, HIDDEN), jnp.float32)],
        compiler_params=pltpu.CompilerParams(
            dimension_semantics=("arbitrary",)),
    )(*const_inputs, *layer_inputs)


# ---------------- pure-JAX reference (f32, module semantics) ----------------
_RDOT = partial(jnp.dot, preferred_element_type=jnp.float32,
                precision=jax.lax.Precision.HIGHEST)


def _rope_ref(x, cos, sin):
    half = HEAD_DIM // 2
    x1, x2 = x[:, :half], x[:, half:]
    return jnp.concatenate([x1 * cos - x2 * sin, x2 * cos + x1 * sin], axis=-1)


def _layer_reference(hidden, resid, cos, sin, lp):
    x = hidden + resid
    res1 = x
    h = _rmsnorm(x, lp["ln1"])
    q = _RDOT(h, lp["w_q"]) + lp["b_q"]
    k = _RDOT(h, lp["w_k"]) + lp["b_k"]
    v = _RDOT(h, lp["w_v"]) + lp["b_v"]
    q = _rmsnorm(q, lp["q_norm"])
    k = _rmsnorm(k, lp["k_norm"])

    T = hidden.shape[0]
    causal = jnp.arange(T)[None, :] <= jnp.arange(T)[:, None]
    k_heads = [_rope_ref(k[:, g * HEAD_DIM:(g + 1) * HEAD_DIM], cos, sin)
               for g in range(N_KV_HEADS)]
    v_heads = [v[:, g * HEAD_DIM:(g + 1) * HEAD_DIM] for g in range(N_KV_HEADS)]
    outs = []
    for hh in range(N_HEADS):
        q_h = _rope_ref(q[:, hh * HEAD_DIM:(hh + 1) * HEAD_DIM], cos, sin)
        k_h, v_h = k_heads[hh // GROUP], v_heads[hh // GROUP]
        sc = _RDOT(q_h, k_h.T) * SCALE
        sc = jnp.where(causal, sc, NEG_INF)
        sc = sc - jnp.max(sc, axis=-1, keepdims=True)
        pp = jnp.exp(sc)
        pp = pp / jnp.sum(pp, axis=-1, keepdims=True)
        outs.append(_RDOT(pp, v_h))
    attn_out = _RDOT(jnp.concatenate(outs, axis=-1), lp["w_o"])

    x2 = attn_out + res1
    res2 = x2
    h2 = _rmsnorm(x2, lp["ln2"])
    gate = _RDOT(h2, lp["w_gate"])
    up = _RDOT(h2, lp["w_up"])
    act = gate * (1.0 / (1.0 + jnp.exp(-gate))) * up
    return _RDOT(act, lp["w_down"]), res2


def molmo_model_reference(input_ids, positions, params):
    hidden = jnp.take(params["embed"], input_ids, axis=0)
    resid = jnp.zeros_like(hidden)
    inv_freq = 1.0 / (ROPE_THETA ** (
        jnp.arange(0, HEAD_DIM, 2, dtype=jnp.float32) / HEAD_DIM))
    freqs = positions.astype(jnp.float32)[:, None] * inv_freq[None, :]
    cos, sin = jnp.cos(freqs), jnp.sin(freqs)
    stacked = params["layers"]
    for l in range(N_LAYERS):
        lp = {name: arr[l] for name, arr in stacked.items()}
        hidden, resid = _layer_reference(hidden, resid, cos, sin, lp)
    return _rmsnorm(hidden + resid, params["final_norm"])


# ---------------- deterministic parameter init ----------------
def _normal(key, shape, scale=0.02):
    return scale * jax.random.normal(key, shape, dtype=jnp.float32)


def init_params(key):
    ks = jax.random.split(key, 16)
    L = N_LAYERS
    return {
        "embed": _normal(ks[0], (VOCAB, HIDDEN)),
        "final_norm": 1.0 + _normal(ks[1], (1, HIDDEN), 0.01),
        "layers": {
            "ln1":    1.0 + _normal(ks[2], (L, 1, HIDDEN), 0.01),
            "w_q":    _normal(ks[3], (L, HIDDEN, Q_SIZE)),
            "b_q":    _normal(ks[4], (L, 1, Q_SIZE)),          # config.qkv_bias=True
            "w_k":    _normal(ks[5], (L, HIDDEN, KV_SIZE)),
            "b_k":    _normal(ks[6], (L, 1, KV_SIZE)),
            "w_v":    _normal(ks[7], (L, HIDDEN, KV_SIZE)),
            "b_v":    _normal(ks[8], (L, 1, KV_SIZE)),
            "q_norm": 1.0 + _normal(ks[9], (L, 1, Q_SIZE), 0.01),
            "k_norm": 1.0 + _normal(ks[10], (L, 1, KV_SIZE), 0.01),
            "w_o":    _normal(ks[11], (L, Q_SIZE, HIDDEN)),
            "ln2":    1.0 + _normal(ks[12], (L, 1, HIDDEN), 0.01),
            "w_gate": _normal(ks[13], (L, HIDDEN, FFN)),
            "w_up":   _normal(ks[14], (L, HIDDEN, FFN)),
            "w_down": _normal(ks[15], (L, FFN, HIDDEN)),
        },
    }


if __name__ == "__main__":
    key = jax.random.PRNGKey(0)
    k_params, k_ids = jax.random.split(key)
    params = init_params(k_params)

    input_ids = jax.random.randint(k_ids, (SEQ,), 0, VOCAB, dtype=jnp.int32)
    positions = jnp.arange(SEQ, dtype=jnp.int32)

    out = jax.block_until_ready(molmo_model_forward(input_ids, positions, params))
    ref = molmo_model_reference(input_ids, positions, params)

    assert out.shape == (SEQ, HIDDEN), out.shape
    assert bool(jnp.all(jnp.isfinite(out)))
    max_abs = float(jnp.max(jnp.abs(out - ref)))
    ref_scale = float(jnp.max(jnp.abs(ref)))
    # bf16-MXU kernel vs f32 HIGHEST-precision reference: mixed abs/rel tolerance.
    assert max_abs <= 5e-2 * max(1.0, ref_scale), (max_abs, ref_scale)

    print("KERNEL_OK")
</pallas_src>

<mosaic_0001>
module attributes {stable_mosaic.version = 11 : i64} {
  func.func @fused_model_kernel(%arg0: i32, %arg1: memref<8x64xf32, #tpu.memory_space<vmem>>, %arg2: memref<32x16xf32, #tpu.memory_space<vmem>>, %arg3: memref<8x64xf32, #tpu.memory_space<vmem>>, %arg4: memref<8x64xf32, #tpu.memory_space<vmem>>, %arg5: memref<8x32xf32, #tpu.memory_space<vmem>>, %arg6: memref<8x32xf32, #tpu.memory_space<vmem>>, %arg7: memref<64x64xbf16, #tpu.memory_space<vmem>>, %arg8: memref<32x32xbf16, #tpu.memory_space<vmem>>, %arg9: memref<1x64xf32, #tpu.memory_space<vmem>>, %arg10: memref<1x1x64xf32, #tpu.memory_space<vmem>>, %arg11: memref<1x64x64xbf16, #tpu.memory_space<vmem>>, %arg12: memref<1x1x64xf32, #tpu.memory_space<vmem>>, %arg13: memref<1x64x32xbf16, #tpu.memory_space<vmem>>, %arg14: memref<1x1x32xf32, #tpu.memory_space<vmem>>, %arg15: memref<1x64x32xbf16, #tpu.memory_space<vmem>>, %arg16: memref<1x1x32xf32, #tpu.memory_space<vmem>>, %arg17: memref<1x1x64xf32, #tpu.memory_space<vmem>>, %arg18: memref<1x1x32xf32, #tpu.memory_space<vmem>>, %arg19: memref<1x64x64xbf16, #tpu.memory_space<vmem>>, %arg20: memref<1x1x64xf32, #tpu.memory_space<vmem>>, %arg21: memref<1x64x64xbf16, #tpu.memory_space<vmem>>, %arg22: memref<1x64x64xbf16, #tpu.memory_space<vmem>>, %arg23: memref<1x64x64xbf16, #tpu.memory_space<vmem>>, %arg24: memref<8x64xf32, #tpu.memory_space<vmem>>, %arg25: memref<8x64xf32, #tpu.memory_space<vmem>>, %arg26: memref<8x64xf32, #tpu.memory_space<vmem>>) attributes {dimension_semantics = [#tpu.dimension_semantics<arbitrary>], iteration_bounds = array<i64: 2>, scalar_prefetch = 0 : i64, scratch_operands = 2 : i64, tpu.core_type = #tpu.core_type<tc>, window_params = [{pipeline_mode = #tpu.pipeline_mode<synchronous>, transform_indices = @transform_0, window_bounds = array<i64: 8, 64>}, {pipeline_mode = #tpu.pipeline_mode<synchronous>, transform_indices = @transform_1, window_bounds = array<i64: 32, 16>}, {pipeline_mode = #tpu.pipeline_mode<synchronous>, transform_indices = @transform_2, window_bounds = array<i64: 8, 64>}, {pipeline_mode = #tpu.pipeline_mode<synchronous>, transform_indices = @transform_3, window_bounds = array<i64: 8, 64>}, {pipeline_mode = #tpu.pipeline_mode<synchronous>, transform_indices = @transform_4, window_bounds = array<i64: 8, 32>}, {pipeline_mode = #tpu.pipeline_mode<synchronous>, transform_indices = @transform_5, window_bounds = array<i64: 8, 32>}, {pipeline_mode = #tpu.pipeline_mode<synchronous>, transform_indices = @transform_6, window_bounds = array<i64: 64, 64>}, {pipeline_mode = #tpu.pipeline_mode<synchronous>, transform_indices = @transform_7, window_bounds = array<i64: 32, 32>}, {pipeline_mode = #tpu.pipeline_mode<synchronous>, transform_indices = @transform_8, window_bounds = array<i64: 1, 64>}, {transform_indices = @transform_9, window_bounds = array<i64: 1, 1, 64>}, {transform_indices = @transform_10, window_bounds = array<i64: 1, 64, 64>}, {transform_indices = @transform_11, window_bounds = array<i64: 1, 1, 64>}, {transform_indices = @transform_12, window_bounds = array<i64: 1, 64, 32>}, {transform_indices = @transform_13, window_bounds = array<i64: 1, 1, 32>}, {transform_indices = @transform_14, window_bounds = array<i64: 1, 64, 32>}, {transform_indices = @transform_15, window_bounds = array<i64: 1, 1, 32>}, {transform_indices = @transform_16, window_bounds = array<i64: 1, 1, 64>}, {transform_indices = @transform_17, window_bounds = array<i64: 1, 1, 32>}, {transform_indices = @transform_18, window_bounds = array<i64: 1, 64, 64>}, {transform_indices = @transform_19, window_bounds = array<i64: 1, 1, 64>}, {transform_indices = @transform_20, window_bounds = array<i64: 1, 64, 64>}, {transform_indices = @transform_21, window_bounds = array<i64: 1, 64, 64>}, {transform_indices = @transform_22, window_bounds = array<i64: 1, 64, 64>}, {pipeline_mode = #tpu.pipeline_mode<synchronous>, transform_indices = @transform_23, window_bounds = array<i64: 8, 64>}]} {
    %c0_i32 = arith.constant 0 : i32
    %0 = arith.cmpi eq, %arg0, %c0_i32 : i32
    %1 = arith.extui %0 : i1 to i32
    %c0_i32_0 = arith.constant 0 : i32
    %2 = arith.cmpi ne, %1, %c0_i32_0 : i32
    scf.if %2 {
      %c0_92 = arith.constant 0 : index
      %c0_93 = arith.constant 0 : index
      %165 = vector.load %arg1[%c0_92, %c0_93] : memref<8x64xf32, #tpu.memory_space<vmem>>, vector<8x64xf32>
      %c0_94 = arith.constant 0 : index
      %c0_95 = arith.constant 0 : index
      %166 = vector.load %arg25[%c0_94, %c0_95] : memref<8x64xf32, #tpu.memory_space<vmem>>, vector<8x64xf32>
      tpu.vector_store %arg25[%c0_94, %c0_95], %165 {strides = array<i32>} : memref<8x64xf32, #tpu.memory_space<vmem>>, vector<8x64xf32>,
      %cst_96 = arith.constant 0.000000e+00 : f32
      %167 = vector.broadcast %cst_96 : f32 to vector<8x64xf32>
      %c0_97 = arith.constant 0 : index
      %c0_98 = arith.constant 0 : index
      %168 = vector.load %arg26[%c0_97, %c0_98] : memref<8x64xf32, #tpu.memory_space<vmem>>, vector<8x64xf32>
      tpu.vector_store %arg26[%c0_97, %c0_98], %167 {strides = array<i32>} : memref<8x64xf32, #tpu.memory_space<vmem>>, vector<8x64xf32>,
    } else {
    }
    %c0 = arith.constant 0 : index
    %c0_1 = arith.constant 0 : index
    %3 = vector.load %arg25[%c0, %c0_1] : memref<8x64xf32, #tpu.memory_space<vmem>>, vector<8x64xf32>
    %c0_2 = arith.constant 0 : index
    %c0_3 = arith.constant 0 : index
    %4 = vector.load %arg26[%c0_2, %c0_3] : memref<8x64xf32, #tpu.memory_space<vmem>>, vector<8x64xf32>
    %5 = arith.addf %3, %4 : vector<8x64xf32>
    %c0_4 = arith.constant 0 : index
    %c0_5 = arith.constant 0 : index
    %c0_6 = arith.constant 0 : index
    %6 = vector.load %arg10[%c0_4, %c0_5, %c0_6] : memref<1x1x64xf32, #tpu.memory_space<vmem>>, vector<1x1x64xf32>
    %7 = vector.shape_cast %6 : vector<1x1x64xf32> to vector<1x64xf32>
    %8 = arith.mulf %5, %5 : vector<8x64xf32>
    %cst = arith.constant dense<0.000000e+00> : vector<8xf32>
    %9 = vector.multi_reduction <add>, %8, %cst [1] : vector<8x64xf32> to vector<8xf32>
    %10 = vector.shape_cast %9 : vector<8xf32> to vector<8x1xf32>
    %cst_7 = arith.constant 6.400000e+01 : f32
    %11 = vector.broadcast %cst_7 : f32 to vector<8x1xf32>
    %12 = arith.divf %10, %11 : vector<8x1xf32>
    %cst_8 = arith.constant 9.99999997E-7 : f32
    %13 = vector.broadcast %cst_8 : f32 to vector<8x1xf32>
    %14 = arith.addf %12, %13 : vector<8x1xf32>
    %15 = math.rsqrt %14 : vector<8x1xf32>
    %16 = vector.broadcast %15 : vector<8x1xf32> to vector<8x64xf32>
    %17 = arith.mulf %5, %16 : vector<8x64xf32>
    %18 = vector.broadcast %7 : vector<1x64xf32> to vector<8x64xf32>
    %19 = arith.mulf %17, %18 : vector<8x64xf32>
    %20 = arith.truncf %19 : vector<8x64xf32> to vector<8x64xbf16>
    %c0_9 = arith.constant 0 : index
    %c0_10 = arith.constant 0 : index
    %c0_11 = arith.constant 0 : index
    %21 = vector.load %arg11[%c0_9, %c0_10, %c0_11] : memref<1x64x64xbf16, #tpu.memory_space<vmem>>, vector<1x64x64xbf16>
    %22 = vector.shape_cast %21 : vector<1x64x64xbf16> to vector<64x64xbf16>
    %cst_12 = arith.constant dense<0.000000e+00> : vector<8x64xf32>
    %23 = tpu.matmul %20, %22, %cst_12 {dimension_numbers = #tpu.dot_dimension_numbers<[1], [0], [0], [1], [0, 0, 1, 1], [], []>} : vector<8x64xbf16>, vector<64x64xbf16>, vector<8x64xf32> -> vector<8x64xf32>
    %c0_13 = arith.constant 0 : index
    %c0_14 = arith.constant 0 : index
    %c0_15 = arith.constant 0 : index
    %24 = vector.load %arg12[%c0_13, %c0_14, %c0_15] : memref<1x1x64xf32, #tpu.memory_space<vmem>>, vector<1x1x64xf32>
    %25 = vector.shape_cast %24 : vector<1x1x64xf32> to vector<1x64xf32>
    %26 = vector.broadcast %25 : vector<1x64xf32> to vector<8x64xf32>
    %27 = arith.addf %23, %26 : vector<8x64xf32>
    %c0_16 = arith.constant 0 : index
    %c0_17 = arith.constant 0 : index
    %c0_18 = arith.constant 0 : index
    %28 = vector.load %arg13[%c0_16, %c0_17, %c0_18] : memref<1x64x32xbf16, #tpu.memory_space<vmem>>, vector<1x64x32xbf16>
    %29 = vector.shape_cast %28 : vector<1x64x32xbf16> to vector<64x32xbf16>
    %cst_19 = arith.constant dense<0.000000e+00> : vector<8x32xf32>
    %30 = tpu.matmul %20, %29, %cst_19 {dimension_numbers = #tpu.dot_dimension_numbers<[1], [0], [0], [1], [0, 0, 1, 1], [], []>} : vector<8x64xbf16>, vector<64x32xbf16>, vector<8x32xf32> -> vector<8x32xf32>
    %c0_20 = arith.constant 0 : index
    %c0_21 = arith.constant 0 : index
    %c0_22 = arith.constant 0 : index
    %31 = vector.load %arg14[%c0_20, %c0_21, %c0_22] : memref<1x1x32xf32, #tpu.memory_space<vmem>>, vector<1x1x32xf32>
    %32 = vector.shape_cast %31 : vector<1x1x32xf32> to vector<1x32xf32>
    %33 = vector.broadcast %32 : vector<1x32xf32> to vector<8x32xf32>
    %34 = arith.addf %30, %33 : vector<8x32xf32>
    %c0_23 = arith.constant 0 : index
    %c0_24 = arith.constant 0 : index
    %c0_25 = arith.constant 0 : index
    %35 = vector.load %arg15[%c0_23, %c0_24, %c0_25] : memref<1x64x32xbf16, #tpu.memory_space<vmem>>, vector<1x64x32xbf16>
    %36 = vector.shape_cast %35 : vector<1x64x32xbf16> to vector<64x32xbf16>
    %cst_26 = arith.constant dense<0.000000e+00> : vector<8x32xf32>
    %37 = tpu.matmul %20, %36, %cst_26 {dimension_numbers = #tpu.dot_dimension_numbers<[1], [0], [0], [1], [0, 0, 1, 1], [], []>} : vector<8x64xbf16>, vector<64x32xbf16>, vector<8x32xf32> -> vector<8x32xf32>
    %c0_27 = arith.constant 0 : index
    %c0_28 = arith.constant 0 : index
    %c0_29 = arith.constant 0 : index
    %38 = vector.load %arg16[%c0_27, %c0_28, %c0_29] : memref<1x1x32xf32, #tpu.memory_space<vmem>>, vector<1x1x32xf32>
    %39 = vector.shape_cast %38 : vector<1x1x32xf32> to vector<1x32xf32>
    %40 = vector.broadcast %39 : vector<1x32xf32> to vector<8x32xf32>
    %41 = arith.addf %37, %40 : vector<8x32xf32>
    %c0_30 = arith.constant 0 : index
    %c0_31 = arith.constant 0 : index
    %c0_32 = arith.constant 0 : index
    %42 = vector.load %arg17[%c0_30, %c0_31, %c0_32] : memref<1x1x64xf32, #tpu.memory_space<vmem>>, vector<1x1x64xf32>
    %43 = vector.shape_cast %42 : vector<1x1x64xf32> to vector<1x64xf32>
    %44 = arith.mulf %27, %27 : vector<8x64xf32>
    %cst_33 = arith.constant dense<0.000000e+00> : vector<8xf32>
    %45 = vector.multi_reduction <add>, %44, %cst_33 [1] : vector<8x64xf32> to vector<8xf32>
    %46 = vector.shape_cast %45 : vector<8xf32> to vector<8x1xf32>
    %cst_34 = arith.constant 6.400000e+01 : f32
    %47 = vector.broadcast %cst_34 : f32 to vector<8x1xf32>
    %48 = arith.divf %46, %47 : vector<8x1xf32>
    %cst_35 = arith.constant 9.99999997E-7 : f32
    %49 = vector.broadcast %cst_35 : f32 to vector<8x1xf32>
    %50 = arith.addf %48, %49 : vector<8x1xf32>
    %51 = math.rsqrt %50 : vector<8x1xf32>
    %52 = vector.broadcast %51 : vector<8x1xf32> to vector<8x64xf32>
    %53 = arith.mulf %27, %52 : vector<8x64xf32>
    %54 = vector.broadcast %43 : vector<1x64xf32> to vector<8x64xf32>
    %55 = arith.mulf %53, %54 : vector<8x64xf32>
    %c0_36 = arith.constant 0 : index
    %c0_37 = arith.constant 0 : index
    %c0_38 = arith.constant 0 : index
    %56 = vector.load %arg18[%c0_36, %c0_37, %c0_38] : memref<1x1x32xf32, #tpu.memory_space<vmem>>, vector<1x1x32xf32>
    %57 = vector.shape_cast %56 : vector<1x1x32xf32> to vector<1x32xf32>
    %58 = arith.mulf %34, %34 : vector<8x32xf32>
    %cst_39 = arith.constant dense<0.000000e+00> : vector<8xf32>
    %59 = vector.multi_reduction <add>, %58, %cst_39 [1] : vector<8x32xf32> to vector<8xf32>
    %60 = vector.shape_cast %59 : vector<8xf32> to vector<8x1xf32>
    %cst_40 = arith.constant 3.200000e+01 : f32
    %61 = vector.broadcast %cst_40 : f32 to vector<8x1xf32>
    %62 = arith.divf %60, %61 : vector<8x1xf32>
    %cst_41 = arith.constant 9.99999997E-7 : f32
    %63 = vector.broadcast %cst_41 : f32 to vector<8x1xf32>
    %64 = arith.addf %62, %63 : vector<8x1xf32>
    %65 = math.rsqrt %64 : vector<8x1xf32>
    %66 = vector.broadcast %65 : vector<8x1xf32> to vector<8x32xf32>
    %67 = arith.mulf %34, %66 : vector<8x32xf32>
    %68 = vector.broadcast %57 : vector<1x32xf32> to vector<8x32xf32>
    %69 = arith.mulf %67, %68 : vector<8x32xf32>
    %c0_42 = arith.constant 0 : index
    %c0_43 = arith.constant 0 : index
    %70 = vector.load %arg3[%c0_42, %c0_43] : memref<8x64xf32, #tpu.memory_space<vmem>>, vector<8x64xf32>
    %71 = arith.mulf %55, %70 : vector<8x64xf32>
    %c0_44 = arith.constant 0 : index
    %c0_45 = arith.constant 0 : index
    %72 = vector.load %arg7[%c0_44, %c0_45] : memref<64x64xbf16, #tpu.memory_space<vmem>>, vector<64x64xbf16>
    %73 = arith.truncf %55 : vector<8x64xf32> to vector<8x64xbf16>
    %cst_46 = arith.constant dense<0.000000e+00> : vector<8x64xf32>
    %74 = tpu.matmul %73, %72, %cst_46 {dimension_numbers = #tpu.dot_dimension_numbers<[1], [0], [0], [1], [0, 0, 1, 1], [], []>} : vector<8x64xbf16>, vector<64x64xbf16>, vector<8x64xf32> -> vector<8x64xf32>
    %c0_47 = arith.constant 0 : index
    %c0_48 = arith.constant 0 : index
    %75 = vector.load %arg4[%c0_47, %c0_48] : memref<8x64xf32, #tpu.memory_space<vmem>>, vector<8x64xf32>
    %76 = arith.mulf %74, %75 : vector<8x64xf32>
    %77 = arith.addf %71, %76 : vector<8x64xf32>
    %c0_49 = arith.constant 0 : index
    %c0_50 = arith.constant 0 : index
    %78 = vector.load %arg5[%c0_49, %c0_50] : memref<8x32xf32, #tpu.memory_space<vmem>>, vector<8x32xf32>
    %79 = arith.mulf %69, %78 : vector<8x32xf32>
    %c0_51 = arith.constant 0 : index
    %c0_52 = arith.constant 0 : index
    %80 = vector.load %arg8[%c0_51, %c0_52] : memref<32x32xbf16, #tpu.memory_space<vmem>>, vector<32x32xbf16>
    %81 = arith.truncf %69 : vector<8x32xf32> to vector<8x32xbf16>
    %cst_53 = arith.constant dense<0.000000e+00> : vector<8x32xf32>
    %82 = tpu.matmul %81, %80, %cst_53 {dimension_numbers = #tpu.dot_dimension_numbers<[1], [0], [0], [1], [0, 0, 1, 1], [], []>} : vector<8x32xbf16>, vector<32x32xbf16>, vector<8x32xf32> -> vector<8x32xf32>
    %c0_54 = arith.constant 0 : index
    %c0_55 = arith.constant 0 : index
    %83 = vector.load %arg6[%c0_54, %c0_55] : memref<8x32xf32, #tpu.memory_space<vmem>>, vector<8x32xf32>
    %84 = arith.mulf %82, %83 : vector<8x32xf32>
    %85 = arith.addf %79, %84 : vector<8x32xf32>
    %86 = vector.extract_strided_slice %77 {offsets = [0, 0], sizes = [8, 16], strides = [1, 1]} : vector<8x64xf32> to vector<8x16xf32>
    %87 = vector.extract_strided_slice %77 {offsets = [0, 16], sizes = [8, 16], strides = [1, 1]} : vector<8x64xf32> to vector<8x16xf32>
    %88 = vector.extract_strided_slice %77 {offsets = [0, 32], sizes = [8, 16], strides = [1, 1]} : vector<8x64xf32> to vector<8x16xf32>
    %89 = vector.extract_strided_slice %77 {offsets = [0, 48], sizes = [8, 16], strides = [1, 1]} : vector<8x64xf32> to vector<8x16xf32>
    %90 = tpu.concatenate %86, %87, %88, %89 in 0 : vector<8x16xf32>, vector<8x16xf32>, vector<8x16xf32>, vector<8x16xf32> -> vector<32x16xf32>
    %91 = vector.extract_strided_slice %85 {offsets = [0, 0], sizes = [8, 16], strides = [1, 1]} : vector<8x32xf32> to vector<8x16xf32>
    %92 = vector.extract_strided_slice %85 {offsets = [0, 16], sizes = [8, 16], strides = [1, 1]} : vector<8x32xf32> to vector<8x16xf32>
    %93 = tpu.concatenate %91, %92 in 0 : vector<8x16xf32>, vector<8x16xf32> -> vector<16x16xf32>
    %94 = vector.extract_strided_slice %41 {offsets = [0, 0], sizes = [8, 16], strides = [1, 1]} : vector<8x32xf32> to vector<8x16xf32>
    %95 = vector.extract_strided_slice %41 {offsets = [0, 16], sizes = [8, 16], strides = [1, 1]} : vector<8x32xf32> to vector<8x16xf32>
    %96 = tpu.concatenate %94, %95 in 0 : vector<8x16xf32>, vector<8x16xf32> -> vector<16x16xf32>
    %97 = arith.truncf %90 : vector<32x16xf32> to vector<32x16xbf16>
    %98 = arith.truncf %93 : vector<16x16xf32> to vector<16x16xbf16>
    %cst_56 = arith.constant dense<0.000000e+00> : vector<32x16xf32>
    %99 = tpu.matmul %97, %98, %cst_56 {dimension_numbers = #tpu.dot_dimension_numbers<[1], [1], [0], [0], [0, 0, 1, 0], [], []>} : vector<32x16xbf16>, vector<16x16xbf16>, vector<32x16xf32> -> vector<32x16xf32>
    %cst_57 = arith.constant 2.500000e-01 : f32
    %100 = vector.broadcast %cst_57 : f32 to vector<32x16xf32>
    %101 = arith.mulf %99, %100 : vector<32x16xf32>
    %c0_58 = arith.constant 0 : index
    %c0_59 = arith.constant 0 : index
    %102 = vector.load %arg2[%c0_58, %c0_59] : memref<32x16xf32, #tpu.memory_space<vmem>>, vector<32x16xf32>
    %103 = arith.addf %101, %102 : vector<32x16xf32>
    %cst_60 = arith.constant dense<0xFF800000> : vector<32xf32>
    %104 = vector.multi_reduction <maximumf>, %103, %cst_60 [1] : vector<32x16xf32> to vector<32xf32>
    %105 = vector.shape_cast %104 : vector<32xf32> to vector<32x1xf32>
    %106 = vector.broadcast %105 : vector<32x1xf32> to vector<32x16xf32>
    %107 = arith.subf %103, %106 : vector<32x16xf32>
    %108 = math.exp %107 : vector<32x16xf32>
    %cst_61 = arith.constant dense<0.000000e+00> : vector<32xf32>
    %109 = vector.multi_reduction <add>, %108, %cst_61 [1] : vector<32x16xf32> to vector<32xf32>
    %110 = vector.shape_cast %109 : vector<32xf32> to vector<32x1xf32>
    %111 = tpu.reciprocal %110 {approx = true} : vector<32x1xf32> -> vector<32x1xf32>
    %112 = vector.broadcast %111 : vector<32x1xf32> to vector<32x16xf32>
    %113 = arith.mulf %108, %112 : vector<32x16xf32>
    %114 = arith.truncf %113 : vector<32x16xf32> to vector<32x16xbf16>
    %115 = arith.truncf %96 : vector<16x16xf32> to vector<16x16xbf16>
    %cst_62 = arith.constant dense<0.000000e+00> : vector<32x16xf32>
    %116 = tpu.matmul %114, %115, %cst_62 {dimension_numbers = #tpu.dot_dimension_numbers<[1], [0], [0], [1], [0, 0, 1, 1], [], []>} : vector<32x16xbf16>, vector<16x16xbf16>, vector<32x16xf32> -> vector<32x16xf32>
    %117 = vector.extract_strided_slice %116 {offsets = [0, 0], sizes = [8, 16], strides = [1, 1]} : vector<32x16xf32> to vector<8x16xf32>
    %118 = vector.extract_strided_slice %116 {offsets = [8, 0], sizes = [8, 16], strides = [1, 1]} : vector<32x16xf32> to vector<8x16xf32>
    %119 = vector.extract_strided_slice %116 {offsets = [16, 0], sizes = [8, 16], strides = [1, 1]} : vector<32x16xf32> to vector<8x16xf32>
    %120 = vector.extract_strided_slice %116 {offsets = [24, 0], sizes = [8, 16], strides = [1, 1]} : vector<32x16xf32> to vector<8x16xf32>
    %121 = tpu.concatenate %117, %118, %119, %120 in 1 : vector<8x16xf32>, vector<8x16xf32>, vector<8x16xf32>, vector<8x16xf32> -> vector<8x64xf32>
    %c0_63 = arith.constant 0 : index
    %c0_64 = arith.constant 0 : index
    %c0_65 = arith.constant 0 : index
    %122 = vector.load %arg19[%c0_63, %c0_64, %c0_65] : memref<1x64x64xbf16, #tpu.memory_space<vmem>>, vector<1x64x64xbf16>
    %123 = vector.shape_cast %122 : vector<1x64x64xbf16> to vector<64x64xbf16>
    %124 = arith.truncf %121 : vector<8x64xf32> to vector<8x64xbf16>
    %cst_66 = arith.constant dense<0.000000e+00> : vector<8x64xf32>
    %125 = tpu.matmul %124, %123, %cst_66 {dimension_numbers = #tpu.dot_dimension_numbers<[1], [0], [0], [1], [0, 0, 1, 1], [], []>} : vector<8x64xbf16>, vector<64x64xbf16>, vector<8x64xf32> -> vector<8x64xf32>
    %126 = arith.addf %125, %5 : vector<8x64xf32>
    %c0_67 = arith.constant 0 : index
    %c0_68 = arith.constant 0 : index
    %c0_69 = arith.constant 0 : index
    %127 = vector.load %arg20[%c0_67, %c0_68, %c0_69] : memref<1x1x64xf32, #tpu.memory_space<vmem>>, vector<1x1x64xf32>
    %128 = vector.shape_cast %127 : vector<1x1x64xf32> to vector<1x64xf32>
    %129 = arith.mulf %126, %126 : vector<8x64xf32>
    %cst_70 = arith.constant dense<0.000000e+00> : vector<8xf32>
    %130 = vector.multi_reduction <add>, %129, %cst_70 [1] : vector<8x64xf32> to vector<8xf32>
    %131 = vector.shape_cast %130 : vector<8xf32> to vector<8x1xf32>
    %cst_71 = arith.constant 6.400000e+01 : f32
    %132 = vector.broadcast %cst_71 : f32 to vector<8x1xf32>
    %133 = arith.divf %131, %132 : vector<8x1xf32>
    %cst_72 = arith.constant 9.99999997E-7 : f32
    %134 = vector.broadcast %cst_72 : f32 to vector<8x1xf32>
    %135 = arith.addf %133, %134 : vector<8x1xf32>
    %136 = math.rsqrt %135 : vector<8x1xf32>
    %137 = vector.broadcast %136 : vector<8x1xf32> to vector<8x64xf32>
    %138 = arith.mulf %126, %137 : vector<8x64xf32>
    %139 = vector.broadcast %128 : vector<1x64xf32> to vector<8x64xf32>
    %140 = arith.mulf %138, %139 : vector<8x64xf32>
    %141 = arith.truncf %140 : vector<8x64xf32> to vector<8x64xbf16>
    %c0_73 = arith.constant 0 : index
    %c0_74 = arith.constant 0 : index
    %c0_75 = arith.constant 0 : index
    %142 = vector.load %arg21[%c0_73, %c0_74, %c0_75] : memref<1x64x64xbf16, #tpu.memory_space<vmem>>, vector<1x64x64xbf16>
    %143 = vector.shape_cast %142 : vector<1x64x64xbf16> to vector<64x64xbf16>
    %cst_76 = arith.constant dense<0.000000e+00> : vector<8x64xf32>
    %144 = tpu.matmul %141, %143, %cst_76 {dimension_numbers = #tpu.dot_dimension_numbers<[1], [0], [0], [1], [0, 0, 1, 1], [], []>} : vector<8x64xbf16>, vector<64x64xbf16>, vector<8x64xf32> -> vector<8x64xf32>
    %c0_77 = arith.constant 0 : index
    %c0_78 = arith.constant 0 : index
    %c0_79 = arith.constant 0 : index
    %145 = vector.load %arg22[%c0_77, %c0_78, %c0_79] : memref<1x64x64xbf16, #tpu.memory_space<vmem>>, vector<1x64x64xbf16>
    %146 = vector.shape_cast %145 : vector<1x64x64xbf16> to vector<64x64xbf16>
    %cst_80 = arith.constant dense<0.000000e+00> : vector<8x64xf32>
    %147 = tpu.matmul %141, %146, %cst_80 {dimension_numbers = #tpu.dot_dimension_numbers<[1], [0], [0], [1], [0, 0, 1, 1], [], []>} : vector<8x64xbf16>, vector<64x64xbf16>, vector<8x64xf32> -> vector<8x64xf32>
    %cst_81 = arith.constant 0.000000e+00 : f32
    %148 = vector.broadcast %cst_81 : f32 to vector<8x64xf32>
    %149 = arith.subf %148, %144 : vector<8x64xf32>
    %150 = math.exp %149 : vector<8x64xf32>
    %cst_82 = arith.constant 1.000000e+00 : f32
    %151 = vector.broadcast %cst_82 : f32 to vector<8x64xf32>
    %152 = arith.addf %151, %150 : vector<8x64xf32>
    %153 = tpu.reciprocal %152 {approx = true} : vector<8x64xf32> -> vector<8x64xf32>
    %154 = arith.mulf %144, %153 : vector<8x64xf32>
    %155 = arith.mulf %154, %147 : vector<8x64xf32>
    %c0_83 = arith.constant 0 : index
    %c0_84 = arith.constant 0 : index
    %c0_85 = arith.constant 0 : index
    %156 = vector.load %arg23[%c0_83, %c0_84, %c0_85] : memref<1x64x64xbf16, #tpu.memory_space<vmem>>, vector<1x64x64xbf16>
    %157 = vector.shape_cast %156 : vector<1x64x64xbf16> to vector<64x64xbf16>
    %158 = arith.truncf %155 : vector<8x64xf32> to vector<8x64xbf16>
    %cst_86 = arith.constant dense<0.000000e+00> : vector<8x64xf32>
    %159 = tpu.matmul %158, %157, %cst_86 {dimension_numbers = #tpu.dot_dimension_numbers<[1], [0], [0], [1], [0, 0, 1, 1], [], []>} : vector<8x64xbf16>, vector<64x64xbf16>, vector<8x64xf32> -> vector<8x64xf32>
    %c0_87 = arith.constant 0 : index
    %c0_88 = arith.constant 0 : index
    %160 = vector.load %arg25[%c0_87, %c0_88] : memref<8x64xf32, #tpu.memory_space<vmem>>, vector<8x64xf32>
    tpu.vector_store %arg25[%c0_87, %c0_88], %159 {strides = array<i32>} : memref<8x64xf32, #tpu.memory_space<vmem>>, vector<8x64xf32>,
    %c0_89 = arith.constant 0 : index
    %c0_90 = arith.constant 0 : index
    %161 = vector.load %arg26[%c0_89, %c0_90] : memref<8x64xf32, #tpu.memory_space<vmem>>, vector<8x64xf32>
    tpu.vector_store %arg26[%c0_89, %c0_90], %126 {strides = array<i32>} : memref<8x64xf32, #tpu.memory_space<vmem>>, vector<8x64xf32>,
    %c1_i32 = arith.constant 1 : i32
    %162 = arith.cmpi eq, %arg0, %c1_i32 : i32
    %163 = arith.extui %162 : i1 to i32
    %c0_i32_91 = arith.constant 0 : i32
    %164 = arith.cmpi ne, %163, %c0_i32_91 : i32
    scf.if %164 {
      %165 = arith.addf %159, %126 : vector<8x64xf32>
      %c0_92 = arith.constant 0 : index
      %c0_93 = arith.constant 0 : index
      %166 = vector.load %arg9[%c0_92, %c0_93] : memref<1x64xf32, #tpu.memory_space<vmem>>, vector<1x64xf32>
      %167 = arith.mulf %165, %165 : vector<8x64xf32>
      %cst_94 = arith.constant dense<0.000000e+00> : vector<8xf32>
      %168 = vector.multi_reduction <add>, %167, %cst_94 [1] : vector<8x64xf32> to vector<8xf32>
      %169 = vector.shape_cast %168 : vector<8xf32> to vector<8x1xf32>
      %cst_95 = arith.constant 6.400000e+01 : f32
      %170 = vector.broadcast %cst_95 : f32 to vector<8x1xf32>
      %171 = arith.divf %169, %170 : vector<8x1xf32>
      %cst_96 = arith.constant 9.99999997E-7 : f32
      %172 = vector.broadcast %cst_96 : f32 to vector<8x1xf32>
      %173 = arith.addf %171, %172 : vector<8x1xf32>
      %174 = math.rsqrt %173 : vector<8x1xf32>
      %175 = vector.broadcast %174 : vector<8x1xf32> to vector<8x64xf32>
      %176 = arith.mulf %165, %175 : vector<8x64xf32>
      %177 = vector.broadcast %166 : vector<1x64xf32> to vector<8x64xf32>
      %178 = arith.mulf %176, %177 : vector<8x64xf32>
      %c0_97 = arith.constant 0 : index
      %c0_98 = arith.constant 0 : index
      %179 = vector.load %arg24[%c0_97, %c0_98] : memref<8x64xf32, #tpu.memory_space<vmem>>, vector<8x64xf32>
      tpu.vector_store %arg24[%c0_97, %c0_98], %178 {strides = array<i32>} : memref<8x64xf32, #tpu.memory_space<vmem>>, vector<8x64xf32>,
    } else {
    }
    return
  }
  func.func @transform_0(%arg0: i32) -> (i32, i32) {
    %c0_i32 = arith.constant 0 : i32
    %c0_i32_0 = arith.constant 0 : i32
    %c0_i32_1 = arith.constant 0 : i32
    return %c0_i32, %c0_i32_0 : i32, i32
  }
  func.func @transform_1(%arg0: i32) -> (i32, i32) {
    %c0_i32 = arith.constant 0 : i32
    %c0_i32_0 = arith.constant 0 : i32
    %c0_i32_1 = arith.constant 0 : i32
    return %c0_i32, %c0_i32_0 : i32, i32
  }
  func.func @transform_2(%arg0: i32) -> (i32, i32) {
    %c0_i32 = arith.constant 0 : i32
    %c0_i32_0 = arith.constant 0 : i32
    %c0_i32_1 = arith.constant 0 : i32
    return %c0_i32, %c0_i32_0 : i32, i32
  }
  func.func @transform_3(%arg0: i32) -> (i32, i32) {
    %c0_i32 = arith.constant 0 : i32
    %c0_i32_0 = arith.constant 0 : i32
    %c0_i32_1 = arith.constant 0 : i32
    return %c0_i32, %c0_i32_0 : i32, i32
  }
  func.func @transform_4(%arg0: i32) -> (i32, i32) {
    %c0_i32 = arith.constant 0 : i32
    %c0_i32_0 = arith.constant 0 : i32
    %c0_i32_1 = arith.constant 0 : i32
    return %c0_i32, %c0_i32_0 : i32, i32
  }
  func.func @transform_5(%arg0: i32) -> (i32, i32) {
    %c0_i32 = arith.constant 0 : i32
    %c0_i32_0 = arith.constant 0 : i32
    %c0_i32_1 = arith.constant 0 : i32
    return %c0_i32, %c0_i32_0 : i32, i32
  }
  func.func @transform_6(%arg0: i32) -> (i32, i32) {
    %c0_i32 = arith.constant 0 : i32
    %c0_i32_0 = arith.constant 0 : i32
    %c0_i32_1 = arith.constant 0 : i32
    return %c0_i32, %c0_i32_0 : i32, i32
  }
  func.func @transform_7(%arg0: i32) -> (i32, i32) {
    %c0_i32 = arith.constant 0 : i32
    %c0_i32_0 = arith.constant 0 : i32
    %c0_i32_1 = arith.constant 0 : i32
    return %c0_i32, %c0_i32_0 : i32, i32
  }
  func.func @transform_8(%arg0: i32) -> (i32, i32) {
    %c0_i32 = arith.constant 0 : i32
    %c0_i32_0 = arith.constant 0 : i32
    %c0_i32_1 = arith.constant 0 : i32
    return %c0_i32, %c0_i32_0 : i32, i32
  }
  func.func @transform_9(%arg0: i32) -> (i32, i32, i32) {
    %c0_i32 = arith.constant 0 : i32
    %c0_i32_0 = arith.constant 0 : i32
    %c0_i32_1 = arith.constant 0 : i32
    return %arg0, %c0_i32, %c0_i32_0 : i32, i32, i32
  }
  func.func @transform_10(%arg0: i32) -> (i32, i32, i32) {
    %c0_i32 = arith.constant 0 : i32
    %c0_i32_0 = arith.constant 0 : i32
    %c0_i32_1 = arith.constant 0 : i32
    return %arg0, %c0_i32, %c0_i32_0 : i32, i32, i32
  }
  func.func @transform_11(%arg0: i32) -> (i32, i32, i32) {
    %c0_i32 = arith.constant 0 : i32
    %c0_i32_0 = arith.constant 0 : i32
    %c0_i32_1 = arith.constant 0 : i32
    return %arg0, %c0_i32, %c0_i32_0 : i32, i32, i32
  }
  func.func @transform_12(%arg0: i32) -> (i32, i32, i32) {
    %c0_i32 = arith.constant 0 : i32
    %c0_i32_0 = arith.constant 0 : i32
    %c0_i32_1 = arith.constant 0 : i32
    return %arg0, %c0_i32, %c0_i32_0 : i32, i32, i32
  }
  func.func @transform_13(%arg0: i32) -> (i32, i32, i32) {
    %c0_i32 = arith.constant 0 : i32
    %c0_i32_0 = arith.constant 0 : i32
    %c0_i32_1 = arith.constant 0 : i32
    return %arg0, %c0_i32, %c0_i32_0 : i32, i32, i32
  }
  func.func @transform_14(%arg0: i32) -> (i32, i32, i32) {
    %c0_i32 = arith.constant 0 : i32
    %c0_i32_0 = arith.constant 0 : i32
    %c0_i32_1 = arith.constant 0 : i32
    return %arg0, %c0_i32, %c0_i32_0 : i32, i32, i32
  }
  func.func @transform_15(%arg0: i32) -> (i32, i32, i32) {
    %c0_i32 = arith.constant 0 : i32
    %c0_i32_0 = arith.constant 0 : i32
    %c0_i32_1 = arith.constant 0 : i32
    return %arg0, %c0_i32, %c0_i32_0 : i32, i32, i32
  }
  func.func @transform_16(%arg0: i32) -> (i32, i32, i32) {
    %c0_i32 = arith.constant 0 : i32
    %c0_i32_0 = arith.constant 0 : i32
    %c0_i32_1 = arith.constant 0 : i32
    return %arg0, %c0_i32, %c0_i32_0 : i32, i32, i32
  }
  func.func @transform_17(%arg0: i32) -> (i32, i32, i32) {
    %c0_i32 = arith.constant 0 : i32
    %c0_i32_0 = arith.constant 0 : i32
    %c0_i32_1 = arith.constant 0 : i32
    return %arg0, %c0_i32, %c0_i32_0 : i32, i32, i32
  }
  func.func @transform_18(%arg0: i32) -> (i32, i32, i32) {
    %c0_i32 = arith.constant 0 : i32
    %c0_i32_0 = arith.constant 0 : i32
    %c0_i32_1 = arith.constant 0 : i32
    return %arg0, %c0_i32, %c0_i32_0 : i32, i32, i32
  }
  func.func @transform_19(%arg0: i32) -> (i32, i32, i32) {
    %c0_i32 = arith.constant 0 : i32
    %c0_i32_0 = arith.constant 0 : i32
    %c0_i32_1 = arith.constant 0 : i32
    return %arg0, %c0_i32, %c0_i32_0 : i32, i32, i32
  }
  func.func @transform_20(%arg0: i32) -> (i32, i32, i32) {
    %c0_i32 = arith.constant 0 : i32
    %c0_i32_0 = arith.constant 0 : i32
    %c0_i32_1 = arith.constant 0 : i32
    return %arg0, %c0_i32, %c0_i32_0 : i32, i32, i32
  }
  func.func @transform_21(%arg0: i32) -> (i32, i32, i32) {
    %c0_i32 = arith.constant 0 : i32
    %c0_i32_0 = arith.constant 0 : i32
    %c0_i32_1 = arith.constant 0 : i32
    return %arg0, %c0_i32, %c0_i32_0 : i32, i32, i32
  }
  func.func @transform_22(%arg0: i32) -> (i32, i32, i32) {
    %c0_i32 = arith.constant 0 : i32
    %c0_i32_0 = arith.constant 0 : i32
    %c0_i32_1 = arith.constant 0 : i32
    return %arg0, %c0_i32, %c0_i32_0 : i32, i32, i32
  }
  func.func @transform_23(%arg0: i32) -> (i32, i32) {
    %c0_i32 = arith.constant 0 : i32
    %c0_i32_0 = arith.constant 0 : i32
    %c0_i32_1 = arith.constant 0 : i32
    return %c0_i32, %c0_i32_0 : i32, i32
  }
}

</mosaic_0001>

<bundles_post_ra>
// kernel: tpu_custom_call.1
= control target key start
LH: loop header
LB: loop body
LE: loop exit
PB: predicated region body
PF: predicated region fallthrough
CT: control target
= control target key end

     0   :  { %s3564_s0 = inlined_call_operand.vmem [shape: f32[8,64], index: 0, kind: input, shape index: {}]   ;;  %s3565_s1 = inlined_call_operand.vmem [shape: f32[32,16], index: 1, kind: input, shape index: {}]   ;;  %s3566_s2 = inlined_call_operand.hbm [shape: f32[8,64], index: 2, kind: input, shape index: {}]   ;;  %s3567_s3 = inlined_call_operand.hbm [shape: f32[8,64], index: 3, kind: input, shape index: {}]   ;;  %s3568_s4 = inlined_call_operand.hbm [shape: f32[8,32], index: 4, kind: input, shape index: {}]   ;;  %s3569_s5 = inlined_call_operand.hbm [shape: f32[8,32], index: 5, kind: input, shape index: {}]   ;;  %s3570_s6 = inlined_call_operand.vmem [shape: bf16[64,64], index: 6, kind: input, shape index: {}]   ;;  %s3571_s7 = inlined_call_operand.vmem [shape: bf16[32,32], index: 7, kind: input, shape index: {}]   ;;  %s3572_s8 = inlined_call_operand.hbm [shape: f32[1,64], index: 8, kind: input, shape index: {}]   ;;  %s3573_s9 = inlined_call_operand.vmem [shape: f32[2,1,64], index: 9, kind: input, shape index: {}]   ;;  %s3574_s10 = inlined_call_operand.vmem [shape: bf16[2,64,64], index: 10, kind: input, shape index: {}]   ;;  %s3575_s11 = inlined_call_operand.hbm [shape: f32[2,1,64], index: 11, kind: input, shape index: {}]   ;;  %s3576_s12 = inlined_call_operand.vmem [shape: bf16[2,64,32], index: 12, kind: input, shape index: {}]   ;;  %s3577_s13 = inlined_call_operand.hbm [shape: f32[2,1,32], index: 13, kind: input, shape index: {}]   ;;  %s3578_s14 = inlined_call_operand.vmem [shape: bf16[2,64,32], index: 14, kind: input, shape index: {}]   ;;  %s3579_s15 = inlined_call_operand.vmem [shape: f32[2,1,32], index: 15, kind: input, shape index: {}]   ;;  %s3580_s16 = inlined_call_operand.vmem [shape: f32[2,1,64], index: 16, kind: input, shape index: {}]   ;;  %s3581_s17 = inlined_call_operand.hbm [shape: f32[2,1,32], index: 17, kind: input, shape index: {}]   ;;  %s3582_s18 = inlined_call_operand.vmem [shape: bf16[2,64,64], index: 18, kind: input, shape index: {}]   ;;  %s3583_s19 = inlined_call_operand.vmem [shape: f32[2,1,64], index: 19, kind: input, shape index: {}]   ;;  %s3584_s20 = inlined_call_operand.hbm [shape: bf16[2,64,64], index: 20, kind: input, shape index: {}]   ;;  %s3585_s21 = inlined_call_operand.hbm [shape: bf16[2,64,64], index: 21, kind: input, shape index: {}]   ;;  %s3586_s22 = inlined_call_operand.hbm [shape: bf16[2,64,64], index: 22, kind: input, shape index: {}]   ;;  %s3587_s23 = inlined_call_operand.hbm [shape: f32[8,64], index: 23, kind: output, shape index: {}]  }
   0x1   :  { %3598 = sst [smem:[#allocation34_spill]] %s3564_s0 }
   0x2   :  { %3599 = sst [smem:[#allocation35_spill]] %s3565_s1 }
   0x3   :  { %3600 = sst [smem:[#allocation36_spill]] %s3566_s2 }
   0x4   :  { %3601 = sst [smem:[#allocation37_spill]] %s3567_s3 }
   0x5   :  { %3602 = sst [smem:[#allocation38_spill]] %s3568_s4 }
   0x6   :  { %3603 = sst [smem:[#allocation39_spill]] %s3569_s5 }
   0x7   :  { %3604 = sst [smem:[#allocation40_spill]] %s3570_s6 }
   0x8   :  { %3605 = sst [smem:[#allocation41_spill]] %s3571_s7 }
   0x9   :  { %3606 = sst [smem:[#allocation42_spill]] %s3572_s8 }
   0xa   :  { %3607 = sst [smem:[#allocation43_spill]] %s3573_s9 }
   0xb   :  { %3608 = sst [smem:[#allocation44_spill]] %s3574_s10 }
   0xc   :  { %3609 = sst [smem:[#allocation45_spill]] %s3575_s11 }
   0xd   :  { %3610 = sst [smem:[#allocation46_spill]] %s3576_s12 }
   0xe   :  { %3611 = sst [smem:[#allocation47_spill]] %s3577_s13 }
   0xf   :  { %3612 = sst [smem:[#allocation48_spill]] %s3578_s14 }
  0x10   :  { %3613 = sst [smem:[#allocation49_spill]] %s3579_s15 }
  0x11   :  { %3614 = sst [smem:[#allocation50_spill]] %s3580_s16 }
  0x12   :  { %3615 = sst [smem:[#allocation51_spill]] %s3581_s17 }
  0x13   :  { %3616 = sst [smem:[#allocation52_spill]] %s3582_s18 }
  0x14   :  { %3617 = sst [smem:[#allocation53_spill]] %s3583_s19 }
  0x15   :  { %3618 = sst [smem:[#allocation54_spill]] %s3584_s20 }
  0x16   :  { %3619 = sst [smem:[#allocation55_spill]] %s3585_s21 }
  0x17   :  { %3620 = sst [smem:[#allocation56_spill]] %s3587_s23 }
  0x18   :  { %28 = vsyncpa [#allocation5], 0 }
  0x19   :  { %29 = vsyncpa [#allocation8], 0 }
  0x1a   :  { %30 = vsyncpa [#allocation11], 0 }
  0x1b   :  { %31 = vsyncpa [#allocation14], 0 }
  0x1c   :  { %33 = vsyncpa [#allocation14 + $0x1], 0 }
  0x1d   :  { %34 = vsyncpa [#allocation17], 0 }
  0x1e   :  { %36 = vsyncpa [#allocation17 + $0x1], 0 }
  0x1f   :  { %37 = vsyncpa [#allocation20], 0 }
  0x20   :  { %39 = vsyncpa [#allocation20 + $0x1], 0 }
  0x21   :  { %40 = vsyncpa [#allocation6], 0  ;;  %s3093_s4 = smov 0   ;;  %s3095_s30 = smov 0  }
  0x22   :  { %s3097_s24 = smov 0   ;;  %s3099_s25 = smov 0  }
  0x23 LB: > { %3621 = sst [smem:[#allocation30_spill]] %s2950_s24  ;;  %s3117_s6 = sadd.s32 4294967295, %s2954_s25   ;;  %s2954_s25 = sphi %s3099_s25, %s3664_s25   ;;  %s2950_s24 = sphi %s3097_s24, %s3666_s24   ;;  %s2946_s30 = sphi %s3095_s30, %s3668_s30   ;;  %s2942_s4 = sphi %s3093_s4, %s3667_s4  }
  0x24   : > { %s3622_s26 = sld [smem:[#allocation37_spill]]  ;;  %p2134_p0 = scmp.ge.s32.totalorder %s2954_s25, 1 }
  0x25   : > { %p308_p1 = scmp.eq.s32.totalorder %s3117_s6, 0  ;;  %p625_p2 = scmp.lt.s32.totalorder %s2954_s25, 3 }
  0x26   : > { %p2135_p3 = scmp.ne.s32.totalorder %s3117_s6, 0  ;;  %s2956_s7 = smov [#allocation7]  }
  0x27   : > { %p3123_p4 = pnand %p2134_p0, %p625_p2  ;;  %s657_s28 = sshll.u32 %s2956_s7, 4  ;;  %s658_s28 = int_to_ptr.vmem [resolvable:$true] %s657_s28 }
  0x28   : > { %s3624_s0 = sld [smem:[#allocation39_spill]]  ;;  %s3143_s29 = sadd.s32 1, %s2954_s25  }
  0x29   : > { %p2399_p5 = pneg %p3123_p4  ;;  %3626 = sst [smem:[#allocation31_spill]] %s3143_s29 }
  0x2a   : > { %s655_s2 = sshll.u32 %s3622_s26, 4  ;;  %s2957_s26 = smov [#allocation10]   ;;  %s656_s2 = int_to_ptr.hbm [resolvable:$true] %s655_s2 }
  0x2b   : > { %p3134_p6 = pnand %p2399_p5, %p308_p1  ;;  %s681_s7 = sshll.u32 %s2957_s26, 4  ;;  %s682_s7 = int_to_ptr.vmem [resolvable:$true] %s681_s7 }
  0x2c   : > { %s294_s3 = sadd.s32 1, %s2950_s24  ;;  %p301_p7 = scmp.ne.s32.totalorder %s2950_s24, %s2946_s30 }
  0x2d   : > { %2405 = dma.hbm_to_vmem [thread:$0]  (!%p3134_p6), %s656_s2, 128, %s658_s28, [#allocation8]  }
  0x2e   : > { %s679_s5 = sshll.u32 %s3624_s0, 4  ;;  %s291_s0 = ssub.s32 %s2954_s25, %s3143_s29  ;;  %s680_s5 = int_to_ptr.hbm [resolvable:$true] %s679_s5 }
  0x2f   : > { %2411 = dma.hbm_to_vmem [thread:$0]  (!%p3134_p6), %s680_s5, 128, %s682_s7, [#allocation11]  }
  0x30   : > { %p292_p8 = scmp.eq.s32.totalorder %s291_s0, 0  ;;  %p302_p9 = scmp.eq.s32.totalorder %s2954_s25, 0 }
  0x31   : > { %p307_p10 = scmp.ne.s32.totalorder %s2946_s30, %s2942_s4  ;;  %p2439_p11 = scmp.lt.s32.totalorder %s2954_s25, 2 }
  0x32   : > { %s3155_s23 = scalar_select %p292_p8, %s2950_s24, %s294_s3  }
  0x33   : > { %p303_p12 = por %p302_p9, %p301_p7  ;;  %p3159_p13 = por %p308_p1, %p307_p10 }
  0x34   : > { %3627 = sst [smem:[#allocation32_spill]] %s3155_s23  ;;  %s3164_s2 = sand.u32 1, %s2954_s25  }
  0x35   : > { %s3628_s26 = scalar_select %p3159_p13, 1, 0 }
  0x36   : > { %s3167_s28 = sand.u32 1, %s2950_s24   ;;  %s3630_s11 = sld [smem:[#allocation45_spill]] }
  0x37   : > { %3629 = sst [smem:[#allocation33_spill]] %s3628_s26  ;;  %s727_s4 = scalar_lea.vmem [#allocation13], %s3167_s28 }
  0x38   : > { %s734_s29 = sshll.u32 %s727_s4, 4  ;;  %p3174_p0 = pnand %p2439_p11, %p303_p12  ;;  %s735_s29 = int_to_ptr.vmem [resolvable:$true] %s734_s29 }
  0x39   : > { %s3594_s19 = scalar_lea.sflag [#allocation14], %s3164_s2 }
  0x3a   : > { %p3181_p5 = pneg %p3174_p0 }
  0x3c   : > { %s730_s0 = scalar_lea.hbm %s3630_s11, %s2954_s25  ;;  %s2605_s4 = scalar_lea.hbm %s3630_s11, 2 }
  0x3d   : > { %s732_s3 = sshll.u32 %s730_s0, 4  ;;  %s733_s3 = int_to_ptr.hbm [resolvable:$true] %s732_s3 }
  0x3e   : > { %s2598_s18 = sshra.s32 %s733_s3, 4  ;;  %s2599_s18 = int_to_ptr.hbm [resolvable:$true] %s2598_s18 }
  0x3f   : > { %s2600_s24 = scalar_lea.hbm %s2599_s18, 1  ;;  %p2606_p9 = scmp.lt.s32.totalorder %s2599_s18, %s3630_s11 }
  0x40   : > { %p2601_p2 = scmp.ne.s32.totalorder %s2599_s18, %s2600_s24  ;;  %p2607_p10 = scmp.lt.s32.totalorder %s2605_s4, %s2600_s24 }
  0x42   : > { %p2603_p7 = pnand %p3181_p5, %p2601_p2  ;;  %p2608_p11 = por %p2607_p10, %p2606_p9 }
  0x44   : > { %p2604_p8 = pneg %p2603_p7 }
  0x46   : > { %p2609_p12 = pnand %p2608_p11, %p2604_p8 }
  0x48   : > { %2612 = shalt.err (!%p2609_p12)
}
  0x49   : > { %2418 = dma.hbm_to_vmem [thread:$0]  (!%p3174_p0), %s733_s3, 16, %s735_s29, %s3594_s19  }
  0x4a   : > { %s3633_s17 = sld [smem:[#allocation51_spill]]  ;;  %s789_s15 = scalar_lea.vmem [#allocation16], %s3167_s28 }
  0x4b   : > { %s796_s16 = sshll.u32 %s789_s15, 4  ;;  %s3203_s24 = sshll.u32 %s3167_s28, 5  ;;  %s797_s16 = int_to_ptr.vmem [resolvable:$true] %s796_s16 }
  0x4c   : > { %s3597_s4 = scalar_lea.sflag [#allocation17], %s3164_s2 }
  0x50   : > { %s792_s14 = scalar_lea.hbm %s3633_s17, %s2954_s25  ;;  %s2635_s7 = scalar_lea.hbm %s3633_s17, 2 }
  0x51   : > { %s794_s18 = sshll.u32 %s792_s14, 4  ;;  %s795_s18 = int_to_ptr.hbm [resolvable:$true] %s794_s18 }
  0x52   : > { %s2628_s11 = sshra.s32 %s795_s18, 4  ;;  %s2629_s11 = int_to_ptr.hbm [resolvable:$true] %s2628_s11 }
  0x53   : > { %s2630_s12 = scalar_lea.hbm %s2629_s11, 1  ;;  %p2636_p9 = scmp.lt.s32.totalorder %s2629_s11, %s3633_s17 }
  0x54   : > { %p2631_p2 = scmp.ne.s32.totalorder %s2629_s11, %s2630_s12  ;;  %p2637_p10 = scmp.lt.s32.totalorder %s2635_s7, %s2630_s12 }
  0x56   : > { %p2633_p7 = pnand %p2631_p2, %p3181_p5  ;;  %p2638_p11 = por %p2637_p10, %p2636_p9 }
  0x58   : > { %p2634_p8 = pneg %p2633_p7 }
  0x5a   : > { %p2639_p12 = pnand %p2638_p11, %p2634_p8 }
  0x5c   : > { %2642 = shalt.err (!%p2639_p12)
}
  0x5d   : > { %2424 = dma.hbm_to_vmem [thread:$0]  (!%p3174_p0), %s795_s18, 16, %s797_s16, %s3597_s4  }
  0x5e   : > { %s3219_s14 = sshll.u32 %s2954_s25, 5  ;;  %s3634_s21 = sld [smem:[#allocation55_spill]] }
  0x5f   : > { %s843_s12 = scalar_lea.vmem [#allocation19], %s3203_s24  ;;  %s3635_s17 = sld [smem:[#allocation36_spill]] }
  0x60   : > { %s851_s19 = sshll.u32 %s843_s12, 4  ;;  %s840_s9 = scalar_lea.sflag [#allocation20], %s3164_s2  ;;  %s852_s19 = int_to_ptr.vmem [resolvable:$true] %s851_s19 }
  0x64   : > { %s848_s11 = scalar_lea.hbm %s3634_s21, %s3219_s14  ;;  %s2665_s29 = scalar_lea.hbm %s3634_s21, 64 }
  0x65   : > { %s849_s3 = sshll.u32 %s848_s11, 4  ;;  %s643_s10 = sshll.u32 %s3635_s17, 4  ;;  %s850_s3 = int_to_ptr.hbm [resolvable:$true] %s849_s3  ;;  %s644_s10 = int_to_ptr.hbm [resolvable:$true] %s643_s10 }
  0x66   : > { %s2658_s26 = sshra.s32 %s850_s3, 4  ;;  %s2659_s26 = int_to_ptr.hbm [resolvable:$true] %s2658_s26 }
  0x67   : > { %s2660_s16 = scalar_lea.hbm %s2659_s26, 32  ;;  %p2666_p9 = scmp.lt.s32.totalorder %s2659_s26, %s3634_s21 }
  0x68   : > { %p2661_p2 = scmp.ne.s32.totalorder %s2659_s26, %s2660_s16  ;;  %p2667_p10 = scmp.lt.s32.totalorder %s2665_s29, %s2660_s16 }
  0x6a   : > { %p2663_p7 = pnand %p2661_p2, %p3181_p5  ;;  %p2668_p11 = por %p2667_p10, %p2666_p9 }
  0x6c   : > { %p2664_p8 = pneg %p2663_p7 }
  0x6e   : > { %p2669_p12 = pnand %p2668_p11, %p2664_p8 }
  0x70   : > { %2672 = shalt.err (!%p2669_p12)
}
  0x71   : > { %s2958_s17 = smov 64   ;;  %s2959_s7 = smov 4  }
  0x72   : > { %2430 = dma.hbm_to_vmem [thread:$0]  (!%p3174_p0), %s850_s3, 512, %s852_s19, %s840_s9, %s2958_s17, %s2958_s17, %s2959_s7  }
  0x73   : > { %s2960_s0 = smov [#allocation4]   ;;  %s3636_s15 = sld [smem:[#allocation38_spill]] }
  0x74   : > { %s645_s26 = sshll.u32 %s2960_s0, 4  ;;  %s3637_s8 = sld [smem:[#allocation42_spill]]  ;;  %s646_s26 = int_to_ptr.vmem [resolvable:$true] %s645_s26 }
  0x75   : > { %2402 = dma.hbm_to_vmem [thread:$0]  (!%p3134_p6), %s644_s10, 128, %s646_s26, [#allocation5]  }
  0x76   : > { %s2961_s21 = smov [#allocation9]   ;;  %s2962_s3 = smov [#allocation12]  }
  0x77   : > { %s669_s19 = sshll.u32 %s2961_s21, 4  ;;  %s699_s0 = sshll.u32 %s2962_s3, 4  ;;  %s670_s19 = int_to_ptr.vmem [resolvable:$true] %s669_s19  ;;  %s700_s0 = int_to_ptr.vmem [resolvable:$true] %s699_s0 }
  0x78   : > { %s3638_s13 = sld [smem:[#allocation47_spill]]  ;;  %s752_s26 = scalar_lea.vmem [#allocation15], %s3167_s28 }
  0x79   : > { %s667_s29 = sshll.u32 %s3636_s15, 4  ;;  %s759_s12 = sshll.u32 %s752_s26, 4  ;;  %s668_s29 = int_to_ptr.hbm [resolvable:$true] %s667_s29  ;;  %s760_s12 = int_to_ptr.vmem [resolvable:$true] %s759_s12 }
  0x7a   : > { %s697_s4 = sshll.u32 %s3637_s8, 4  ;;  %s698_s4 = int_to_ptr.hbm [resolvable:$true] %s697_s4 }
  0x7b   : > { %2408 = dma.hbm_to_vmem [thread:$0]  (!%p3134_p6), %s668_s29, 128, %s670_s19, [#allocation8]  }
  0x7c   : > { %2414 = dma.hbm_to_vmem [thread:$0]  (!%p3134_p6), %s698_s4, 16, %s700_s0, [#allocation11]  }
  0x7e   : > { %s755_s15 = scalar_lea.hbm %s3638_s13, %s2954_s25  ;;  %s2785_s3 = scalar_lea.hbm %s3638_s13, 2 }
  0x7f   : > { %s757_s10 = sshll.u32 %s755_s15, 4  ;;  %s758_s10 = int_to_ptr.hbm [resolvable:$true] %s757_s10 }
  0x80   : > { %s2778_s21 = sshra.s32 %s758_s10, 4  ;;  %s2779_s21 = int_to_ptr.hbm [resolvable:$true] %s2778_s21 }
  0x81   : > { %s2780_s11 = scalar_lea.hbm %s2779_s21, 1  ;;  %p2786_p6 = scmp.lt.s32.totalorder %s2779_s21, %s3638_s13 }
  0x82   : > { %p2781_p2 = scmp.ne.s32.totalorder %s2779_s21, %s2780_s11  ;;  %p2787_p9 = scmp.lt.s32.totalorder %s2785_s3, %s2780_s11 }
  0x84   : > { %p2783_p7 = pnand %p2781_p2, %p3181_p5  ;;  %p2788_p10 = por %p2787_p9, %p2786_p6 }
  0x86   : > { %p2784_p8 = pneg %p2783_p7 }
  0x88   : > { %p2789_p11 = pnand %p2788_p10, %p2784_p8 }
  0x8a   : > { %2792 = shalt.err (!%p2789_p11)
}
  0x8b   : > { %s3639_s1 = scalar_lea.sflag [#allocation14], %s3164_s2  ;;  %s3640_s20 = sld [smem:[#allocation54_spill]] }
  0x8c   : > { %2421 = dma.hbm_to_vmem [thread:$0]  (!%p3174_p0), %s758_s10, 16, %s760_s12, %s3639_s1  }
  0x8d   : > { %s821_s15 = scalar_lea.vmem [#allocation18], %s3203_s24 }
  0x8e   : > { %s829_s26 = sshll.u32 %s821_s15, 4  ;;  %s830_s26 = int_to_ptr.vmem [resolvable:$true] %s829_s26 }
  0x91   : > { %s826_s0 = scalar_lea.hbm %s3640_s20, %s3219_s14  ;;  %s2815_s10 = scalar_lea.hbm %s3640_s20, 64 }
  0x92   : > { %s827_s18 = sshll.u32 %s826_s0, 4  ;;  %s828_s18 = int_to_ptr.hbm [resolvable:$true] %s827_s18 }
  0x93   : > { %s2808_s21 = sshra.s32 %s828_s18, 4  ;;  %s2809_s21 = int_to_ptr.hbm [resolvable:$true] %s2808_s21 }
  0x94   : > { %s2810_s11 = scalar_lea.hbm %s2809_s21, 32  ;;  %p2816_p8 = scmp.lt.s32.totalorder %s2809_s21, %s3640_s20 }
  0x95   : > { %p2811_p12 = scmp.ne.s32.totalorder %s2809_s21, %s2810_s11  ;;  %p2817_p6 = scmp.lt.s32.totalorder %s2815_s10, %s2810_s11 }
  0x97   : > { %p2813_p2 = pnand %p2811_p12, %p3181_p5  ;;  %p2818_p9 = por %p2817_p6, %p2816_p8 }
  0x99   : > { %p2814_p7 = pneg %p2813_p2 }
  0x9b   : > { %p2819_p10 = pnand %p2818_p9, %p2814_p7 }
  0x9d   : > { %2822 = shalt.err (!%p2819_p10)
}
  0x9e   : > { %s3641_s16 = scalar_lea.sflag [#allocation17], %s3164_s2  ;;  %s870_s28 = scalar_lea.hbm %s3586_s22, %s3219_s14 }
  0x9f   : > { %2427 = dma.hbm_to_vmem [thread:$0]  (!%p3174_p0), %s828_s18, 512, %s830_s26, %s3641_s16, %s2958_s17, %s2958_s17, %s2959_s7  }
  0xa0   : > { %s871_s4 = sshll.u32 %s870_s28, 4  ;;  %s865_s0 = scalar_lea.vmem [#allocation21], %s3203_s24  ;;  %s872_s4 = int_to_ptr.hbm [resolvable:$true] %s871_s4 }
  0xa1   : > { %s873_s15 = sshll.u32 %s865_s0, 4  ;;  %s2838_s21 = sshra.s32 %s872_s4, 4  ;;  %s874_s15 = int_to_ptr.vmem [resolvable:$true] %s873_s15  ;;  %s2839_s21 = int_to_ptr.hbm [resolvable:$true] %s2838_s21 }
  0xa2   : > { %s2840_s11 = scalar_lea.hbm %s2839_s21, 32  ;;  %s2845_s18 = scalar_lea.hbm %s3586_s22, 64 }
  0xa3   : > { %p2841_p11 = scmp.ne.s32.totalorder %s2839_s21, %s2840_s11  ;;  %p2846_p7 = scmp.lt.s32.totalorder %s2839_s21, %s3586_s22 }
  0xa4   : > { %p2847_p8 = scmp.lt.s32.totalorder %s2845_s18, %s2840_s11 }
  0xa5   : > { %p2843_p12 = pnand %p2841_p11, %p3181_p5 }
  0xa6   : > { %p2848_p6 = por %p2847_p8, %p2846_p7 }
  0xa7   : > { %p2844_p2 = pneg %p2843_p12 }
  0xa9   : > { %p2849_p9 = pnand %p2848_p6, %p2844_p2 }
  0xab   : > { %2852 = shalt.err (!%p2849_p9)
}
  0xac   : > { %2433 = dma.hbm_to_vmem [thread:$0]  (!%p3174_p0), %s872_s4, 512, %s874_s15, %s840_s9, %s2958_s17, %s2958_s17, %s2959_s7  }
  0xad   : > { %885 = sbr.rel (%p3123_p4) target bundleno = 2289 (0x8f1), region = 112 }
  0xb2   : > { %2913 = dma.done.wait (%p308_p1), [#allocation5], 128  }
  0xb3   : > { %2915 = vsyncadd (%p308_p1), [#allocation5], 4294967168 }
  0xb4   : > { %2917 = dma.done.wait (%p308_p1), [#allocation8], 256  }
  0xb5   : > { %2919 = vsyncadd (%p308_p1), [#allocation8], 4294967040 }
  0xb6   : > { %2921 = dma.done.wait (%p308_p1), [#allocation11], 144  }
  0xb7   : > { %2923 = vsyncadd (%p308_p1), [#allocation11], 4294967152  ;;  %s912_s23 = sand.u32 1, %s3117_s6   ;;  %s3330_s27 = sand.u32 1, %s2946_s30  }
  0xb8   : > { %s913_s2 = scalar_lea.sflag [#allocation14], %s912_s23 }
  0xb9   : > { %2925 = dma.done.wait (%p3159_p13), %s913_s2, 32  }
  0xba   : > { %2927 = vsyncadd (%p3159_p13), %s913_s2, 4294967264  ;;  %s931_s14 = scalar_lea.sflag [#allocation17], %s912_s23 }
  0xbb   : > { %2929 = dma.done.wait (%p3159_p13), %s931_s14, 528  }
  0xbc   : > { %2931 = vsyncadd (%p3159_p13), %s931_s14, 4294966768  ;;  %s2156_s7 = sshll.u32 %s3330_s27, 5  ;;  %s950_s3 = scalar_lea.sflag [#allocation20], %s912_s23 }
  0xbd   : > { %s3344_s12 = scalar_lea.vmem [#allocation18], %s2156_s7  ;;  %s3346_s16 = scalar_lea.vmem [#allocation19], %s2156_s7 }
  0xbe   : > { %2933 = dma.done.wait (%p3159_p13), %s950_s3, 1024  }
  0xbf   : > { %2935 = vsyncadd (%p3159_p13), %s950_s3, 4294966272  ;;  %p1076_p1 = scmp.lt.s32.totalorder %s3117_s6, 1  ;;  %s3644_s29 = sld [smem:[#allocation44_spill]] }
  0xc0   : > { %s3645_s10 = sld [smem:[#allocation46_spill]]  ;;  %s3393_s23 = scalar_lea.vmem [#allocation21], %s2156_s7 }
  0xc1   : > { %s3354_s25 = scalar_select %p1076_p1, %s3117_s6, 1 }
  0xc2   : > { %s3646_s14 = sld [smem:[#allocation48_spill]] }
  0xc3   : > { %s2325_s15 = sshll.u32 %s3354_s25, 5  ;;  %s3647_s17 = sld [smem:[#allocation49_spill]] }
  0xc4   : > { %s3648_s0 = sld [smem:[#allocation50_spill]] }
  0xc5   : > { %s3364_s19 = scalar_lea.vmem %s3644_s29, %s2325_s15  ;;  %s3649_s8 = sld [smem:[#allocation52_spill]] }
  0xc6   : > { %s3369_s9 = scalar_lea.vmem %s3645_s10, %s2325_s15  ;;  %s3650_s10 = sld [smem:[#allocation53_spill]] }
  0xc8   : > { %s3374_s3 = scalar_lea.vmem %s3646_s14, %s2325_s15  ;;  %1112 = sbr.rel (%p2135_p3) target bundleno = 209 (0xd1), region = 160 }
  0xc9   : > { %s1096_s4 = scalar_lea.vmem %s3647_s17, %s3354_s25  ;;  %s3651_s14 = sld [smem:[#allocation34_spill]] (!%p2135_p3) }
  0xca   : > { %s1099_s21 = scalar_lea.vmem %s3648_s0, %s3354_s25 }
  0xcb   : > { %s3387_s13 = scalar_lea.vmem %s3649_s8, %s2325_s15 }
  0xcc   : > { %s1107_s20 = scalar_lea.vmem %s3650_s10, %s3354_s25 }
  0xcd   : > { %vm1114_vm0 = vcmask 523264   ;;  %v2963_v1 = vmov 0.0  }
  0xce   : > { %1116 = vst.msk [vmem:[#allocation3] sm:$0xff] %vm1114_vm0, %v2963_v1 }
  0xcf   : > { %v1113_v0 = vld [vmem:[%s3651_s14] sm:$0xff] }
  0xd0   : > { %1115 = vst.msk [vmem:[#allocation2] sm:$0xff] %vm1114_vm0, %v1113_v0 }
  0xd1 PF: > { %vm1122_vm1 = vcmask 523264   ;;  %v2964_v7 = vmov 64.0   ;;  %v2332_v9 = vld [vmem:[%s3364_s19 + $0x18] sm:$0xff]  ;;  %v2331_v13 = vld [vmem:[%s3364_s19 + $0x10] sm:$0xff]  ;;  %v2330_v17 = vld [vmem:[%s3364_s19 + $0x8] sm:$0xff]  ;;  %s3652_s24 = sld [smem:[#allocation43_spill]] }
  0xd2   : > { %2503 = vrcp.f32 %v2964_v7  ;;  %v2336_v10 = vld [vmem:[%s3369_s9 + $0x18] sm:$0xff]  ;;  %1194 = vmatpush.bf16.msra.mxu0 %v2332_v9  ;;  %v2335_v14 = vld [vmem:[%s3369_s9 + $0x10] sm:$0xff]  ;;  %v2334_v18 = vld [vmem:[%s3369_s9 + $0x8] sm:$0xff]  ;;  %s3654_s0 = scalar_lea.vmem [#allocation13], %s3330_s27  ;;  %s3655_s15 = scalar_lea.vmem [#allocation15], %s3330_s27  ;;  %vm1325_vm6 = vcmask 261120  }
  0xd3   : > { %v2340_v11 = vld [vmem:[%s3374_s3 + $0x18] sm:$0xff]  ;;  %1243 = vmatpush.bf16.msra.mxu1 %v2336_v10  ;;  %v2339_v15 = vld [vmem:[%s3374_s3 + $0x10] sm:$0xff]  ;;  %v2338_v19 = vld [vmem:[%s3374_s3 + $0x8] sm:$0xff]  ;;  %v2965_v54 = vmov 32.0   ;;  %s3657_s10 = sld [smem:[#allocation41_spill]]  ;;  %s3658_s5 = scalar_lea.vmem [#allocation16], %s3330_s27 }
  0xd4   : > { %1292 = vmatpush.bf16.msra.mxu2 %v2340_v11  ;;  %v2329_v21 = vld [vmem:[%s3364_s19] sm:$0xff]  ;;  %s2966_s27 = smov 112   ;;  %vm1466_vm14 = vcmask 130048   ;;  %s3660_s1 = sld [smem:[#allocation35_spill]]  ;;  %vm1593_vm15 = vcmask 392192  }
  0xd5   : > { %v1118_v3 = vld [vmem:[#allocation3] sm:$0xff]  ;;  %v2333_v22 = vld [vmem:[%s3369_s9] sm:$0xff]  ;;  %p2317_p3 = scmp.ne.s32.totalorder %s3117_s6, 1 }
  0xd6   : > { %1195 = vmatpush.bf16.msra.mxu0 %v2331_v13  ;;  %v2337_v23 = vld [vmem:[%s3374_s3] sm:$0xff]  ;;  %s3656_s3 = sld [smem:[#allocation40_spill]] }
  0xd7   : > { %v1117_v2 = vld [vmem:[#allocation2] sm:$0xff]  ;;  %1244 = vmatpush.bf16.msra.mxu1 %v2335_v14  ;;  %s3653_s7 = scalar_lea.vmem %s3652_s24, %s3354_s25  ;;  %s2971_s24 = smov 48  }
  0xd8   : > { %v3400_v4 = vadd.f32 %v1118_v3, %v1117_v2  ;;  %v2504_v8 = vpop.eup %2503  ;;  %1293 = vmatpush.bf16.msra.mxu2 %v2339_v15  ;;  %v2496_v35 = vld [vmem:[%s3653_s7] ss:$0 sm:$0xff] }
  0xd9   : > { %v1127_v12 = vmul.f32 64.0, %v2504_v8  ;;  %vm1131_vm2 = vweird.f32 %v2504_v8  ;;  %v2497_v40 = vld [vmem:[%s3654_s0] ss:$0 sm:$0xff]  ;;  %v2346_v61 = vld [vmem:[%s3657_s10 + $0x8] sm:$0xff] }
  0xda   : > { %v1121_v5 = vmul.f32 %v3400_v4, %v3400_v4  ;;  %1196 = vmatpush.bf16.msra.mxu0 %v2330_v17  ;;  %v2498_v41 = vld [vmem:[%s3655_s15] ss:$0 sm:$0xff]  ;;  %s2968_s15 = smov 96  }
  0xdb   : > { %v1128_v16 = vsub.f32 1.0, %v1127_v12  ;;  %1245 = vmatpush.bf16.msra.mxu1 %v2334_v18  ;;  %v2345_v0 = vld [vmem:[%s3657_s10] sm:$0xff] }
  0xdc   : > { %v1123_v6 = vsel %vm1122_vm1, %v1121_v5, 0.0  ;;  %1294 = vmatpush.bf16.msra.mxu2 %v2338_v19  ;;  %v2344_v56 = vld [vmem:[%s3656_s3 + $0x18] sm:$0xff]  ;;  %v2343_v58 = vld [vmem:[%s3656_s3 + $0x10] sm:$0xff]  ;;  %v2342_v60 = vld [vmem:[%s3656_s3 + $0x8] sm:$0xff] }
  0xdd   : > { %1124 = vadd.xlane.f32.xlu0 %v1123_v6  ;;  %v1129_v20 = vmul.f32 %v2504_v8, %v1128_v16  ;;  %1395 = vmatpush.bf16.msra.mxu3 %v2344_v56  ;;  %v2341_v63 = vld [vmem:[%s3656_s3] sm:$0xff] }
  0xde   : > { %1197 = vmatpush.bf16.msra.mxu0 %v2329_v21 }
  0xdf   : > { %v1130_v24 = vadd.f32 %v2504_v8, %v1129_v20  ;;  %1246 = vmatpush.bf16.msra.mxu1 %v2333_v22  ;;  %v2501_v22 = vld [vmem:[%s3658_s5] ss:$0 sm:$0xff]  ;;  %s2970_s5 = smov 32  }
  0xe0   : > { %1295 = vmatpush.bf16.msra.mxu2 %v2337_v23 }
  0xe1   : > { %v3417_v25 = vsel %vm1131_vm2, %v2504_v8, %v1130_v24  ;;  %1396 = vmatpush.bf16.msra.mxu3 %v2343_v58  ;;  %v2500_v24 = vld [vmem:[%s1099_s21] ss:$0 sm:$0xff]  ;;  %s2967_s21 = smov 80  }
  0xe2   : > { %1435 = vmatpush.bf16.msrb.mxu0 %v2346_v61 }
  0xe5   : > { %1397 = vmatpush.bf16.msra.mxu3 %v2342_v60 }
  0xe6   : > { %1436 = vmatpush.bf16.msrb.mxu0 %v2345_v0 }
  0xe9   : > { %1398 = vmatpush.bf16.msra.mxu3 %v2341_v63 }
 0x150   : > { %v1125_v26 = vpop.xlane.xlu0 %1124 }
 0x151   : > { %v1133_v27 = vmul.f32 %v3417_v25, %v1125_v26 }
 0x153   : > { %v1134_v28 = vadd.f32 1e-06, %v1133_v27 }
 0x155   : > { %2505 = vrsqrt.f32 %v1134_v28  ;;  %vm1141_vm4 = vweird.f32 %v1134_v28 }
 0x156   : > { %2507 = vrcp.f32 %v2965_v54 }
 0x15b   : > { %v2506_v29 = vpop.eup %2505 }
 0x15c   : > { %v1136_v30 = vmul.f32 %v2506_v29, %v1134_v28  ;;  %vm1142_vm3 = vweird.f32 %v2506_v29  ;;  %v2508_v55 = vpop.eup %2507 }
 0x15d   : > { %vm1143_vm5 = vmor %vm1141_vm4, %vm1142_vm3  ;;  %v1330_v57 = vmul.f32 32.0, %v2508_v55  ;;  %vm1334_vm7 = vweird.f32 %v2508_v55 }
 0x15e   : > { %v1137_v31 = vmul.f32 %v2506_v29, %v1136_v30 }
 0x15f   : > { %v1331_v59 = vsub.f32 1.0, %v1330_v57  ;;  %v1499_v57 = vld [vmem:[%s3660_s1] sm:$0xff] }
 0x160   : > { %v1138_v32 = vmul.f32 0.5, %v1137_v31 }
 0x161   : > { %v1332_v62 = vmul.f32 %v2508_v55, %v1331_v59 }
 0x162   : > { %v1139_v33 = vsub.f32 1.5, %v1138_v32 }
 0x163   : > { %v1333_v1 = vadd.f32 %v2508_v55, %v1332_v62  ;;  %v1500_v62 = vld [vmem:[%s3660_s1 + $0x8] sm:$0xff] }
 0x164   : > { %v1140_v34 = vmul.f32 %v2506_v29, %v1139_v33  ;;  %v1407_v33 = vld [vmem:[#allocation9] sm:$0xff] }
 0x165   : > { %v1335_v2 = vsel %vm1334_vm7, %v2508_v55, %v1333_v1 }
 0x166   : > { %v1144_v36 = vsel %vm1143_vm5, %v2506_v29, %v1140_v34  ;;  %v1442_v34 = vld [vmem:[#allocation10] sm:$0xff] }
 0x167   : > { %v1145_v37 = vmul.f32 %v1144_v36, %v3400_v4 }
 0x169   : > { %v1149_v38 = vmul.f32 %v2496_v35, %v1145_v37 }
 0x16b   : > { %v1150_v39 = vpack.c.bf16 %v1149_v38, %v1149_v38 }
 0x16d   : > { %2184 = vmatmul.msk.bf16.vlgmr.msra.gmra.mxu0 %vm1122_vm1, %v1150_v39  ;;  %2201 = vmatmul.msk.bf16.vlgmr.msra.gmra.mxu1 %vm1122_vm1, %v1150_v39 }
 0x16e   : > { %2218 = vmatmul.msk.bf16.vlgmr.msra.gmra.mxu2 %vm1122_vm1, %v1150_v39  ;;  %v1353_v39 = vld [vmem:[#allocation4] sm:$0xff] }
 0x1ea   : > { %v1199_v42 = vpop.f32.mrf.mxu0  ;;  %v1248_v43 = vpop.f32.mrf.mxu1 }
 0x1eb   : > { %v3433_v44 = vadd.f32 %v2497_v40, %v1199_v42  ;;  %v1249_v45 = vadd.f32 %v2498_v41, %v1248_v43  ;;  %v1404_v40 = vld [vmem:[#allocation7] sm:$0xff] }
 0x1ed   : > { %v1324_v46 = vmul.f32 %v1249_v45, %v1249_v45  ;;  %v1302_v47 = vmul.f32 %v3433_v44, %v3433_v44 }
 0x1ef   : > { %v1326_v48 = vsel %vm1325_vm6, %v1324_v46, 0.0  ;;  %v1303_v49 = vsel %vm1122_vm1, %v1302_v47, 0.0 }
 0x1f0   : > { %1327 = vadd.xlane.f32.xlu0 %v1326_v48  ;;  %1304 = vadd.xlane.f32.xlu1 %v1303_v49 }
 0x1f1   : > { %v3439_v50 = vpop.f32.mrf.mxu2 }
 0x1f2   : > { %v1201_v51 = vpop.f32.mrf.mxu0  ;;  %v1250_v52 = vpop.f32.mrf.mxu1 }
 0x1f9   : > { %v1299_v53 = vpop.f32.mrf.mxu2 }
 0x263   : > { %v1328_v3 = vpop.xlane.xlu0 %1327  ;;  %v1305_v5 = vpop.xlane.xlu1 %1304 }
 0x264   : > { %v1336_v6 = vmul.f32 %v1335_v2, %v1328_v3  ;;  %v1306_v7 = vmul.f32 %v1305_v5, %v3417_v25  ;;  %v1501_v3 = vld [vmem:[%s3660_s1 + $0x10] sm:$0xff] }
 0x266   : > { %v1337_v8 = vadd.f32 1e-06, %v1336_v6  ;;  %v1307_v9 = vadd.f32 1e-06, %v1306_v7 }
 0x268   : > { %2509 = vrsqrt.f32 %v1337_v8  ;;  %vm1344_vm10 = vweird.f32 %v1337_v8  ;;  %vm1314_vm12 = vweird.f32 %v1307_v9 }
 0x269   : > { %2511 = vrsqrt.f32 %v1307_v9 }
 0x26e   : > { %v2510_v10 = vpop.eup %2509 }
 0x26f   : > { %v2512_v11 = vpop.eup %2511  ;;  %v1339_v12 = vmul.f32 %v2510_v10, %v1337_v8  ;;  %vm1345_vm8 = vweird.f32 %v2510_v10 }
 0x270   : > { %v1309_v13 = vmul.f32 %v2512_v11, %v1307_v9  ;;  %vm1315_vm9 = vweird.f32 %v2512_v11  ;;  %vm1346_vm11 = vmor %vm1344_vm10, %vm1345_vm8  ;;  %v1502_v9 = vld [vmem:[%s3660_s1 + $0x18] sm:$0xff] }
 0x271   : > { %v1340_v14 = vmul.f32 %v2510_v10, %v1339_v12  ;;  %vm1316_vm13 = vmor %vm1314_vm12, %vm1315_vm9 }
 0x272   : > { %v1310_v15 = vmul.f32 %v2512_v11, %v1309_v13  ;;  %v2499_v13 = vld [vmem:[%s1096_s4] ss:$0 sm:$0xff]  ;;  %s2969_s4 = smov 16  }
 0x273   : > { %v1341_v16 = vmul.f32 0.5, %v1340_v14  ;;  %v1298_v14 = vadd.f32 %v2499_v13, %v3439_v50  ;;  %v2356_v13 = vld [vmem:[%s3346_s16 + $0x8] sm:$0xff] }
 0x274   : > { %v1311_v17 = vmul.f32 0.5, %v1310_v15 }
 0x275   : > { %v1342_v18 = vsub.f32 1.5, %v1341_v16 }
 0x276   : > { %v1312_v19 = vsub.f32 1.5, %v1311_v17 }
 0x277   : > { %v1343_v20 = vmul.f32 %v2510_v10, %v1342_v18 }
 0x278   : > { %v1313_v21 = vmul.f32 %v2512_v11, %v1312_v19 }
 0x279   : > { %v1347_v23 = vsel %vm1346_vm11, %v2510_v10, %v1343_v20 }
 0x27a   : > { %v1348_v26 = vmul.f32 %v1347_v23, %v1249_v45  ;;  %v1317_v27 = vsel %vm1316_vm13, %v2512_v11, %v1313_v21 }
 0x27b   : > { %v1318_v28 = vmul.f32 %v1317_v27, %v3433_v44 }
 0x27c   : > { %v1352_v29 = vmul.f32 %v2501_v22, %v1348_v26 }
 0x27d   : > { %v1322_v30 = vmul.f32 %v2500_v24, %v1318_v28 }
 0x27e   : > { %v1413_v31 = vpack.c.bf16 %v1352_v29, %v1352_v29  ;;  %v1408_v36 = vmul.f32 %v1407_v33, %v1352_v29 }
 0x27f   : > { %v1363_v32 = vpack.c.bf16 %v1322_v30, %v1322_v30  ;;  %v1354_v42 = vmul.f32 %v1353_v39, %v1322_v30 }
 0x280   : > { %2244 = vmatmul.msk.bf16.vlgmr.msrb.gmra.mxu0 %vm1325_vm6, %v1413_v31 }
 0x281   : > { %2235 = vmatmul.msk.bf16.vlgmr.msra.gmra.mxu3 %vm1122_vm1, %v1363_v32 }
 0x2fd   : > { %v1438_v35 = vpop.f32.mrf.mxu0 }
 0x2fe   : > { %v1443_v37 = vmul.f32 %v1442_v34, %v1438_v35 }
 0x300   : > { %v1444_v38 = vadd.f32 %v1443_v37, %v1408_v36 }
 0x302   : > { %1456 = vrot.lane.b32.xlu1 %v1444_v38, %s2966_s27 }
 0x304   : > { %v1400_v41 = vpop.f32.mrf.mxu3 }
 0x305   : > { %v1405_v43 = vmul.f32 %v1404_v40, %v1400_v41  ;;  %v1440_v44 = vpop.f32.mrf.mxu0 }
 0x307   : > { %v1406_v45 = vadd.f32 %v1405_v43, %v1354_v42 }
 0x309   : > { %1452 = vrot.lane.b32.xlu0 %v1406_v45, %s2967_s21  ;;  %1446 = vrot.lane.b32.xlu2 %v1406_v45, %s2966_s27 }
 0x30c   : > { %v1402_v46 = vpop.f32.mrf.mxu3 }
 0x311   : > { %1449 = vrot.lane.b32.xlu2 %v1406_v45, %s2968_s15 }
 0x363   : > { %v1447_v51 = vpop.permute.xlu2 %1446 }
 0x364   : > { %v1463_v52 = vpack.c.bf16 %v1447_v51, %v1406_v45 }
 0x36b   : > { %v1450_v54 = vpop.permute.xlu2 %1449 }
 0x374   : > { %v1457_v47 = vpop.permute.xlu1 %1456 }
 0x375   : > { %v1465_v48 = vpack.c.bf16 %v1457_v47, %v1444_v38 }
 0x377   : > { %v1474_v49 = vsel %vm1466_vm14, %v1465_v48, 0 }
 0x378   : > { %1483 = vmatpush.bf16.xpose.msrb.mxu1 %v1474_v49 }
 0x37b   : > { %v1453_v53 = vpop.permute.xlu0 %1452 }
 0x37c   : > { %v1464_v55 = vpack.c.bf16 %v1453_v53, %v1450_v54 }
 0x37f   : > { %2245 = vmatmul.msk.bf16.vlgmr.msrb.gmra.mxu1 %vm1466_vm14, %v1463_v52 }
 0x38f   : > { %2246 = vmatmul.msk.bf16.gmra.mxu1 %vm1466_vm14, %v1464_v55 }
 0x3fc   : > { %v1485_v56 = vpop.f32.mrf.mxu1 }
 0x3fd   : > { %v1495_v58 = vmul.f32 0.25, %v1485_v56  ;;  %v2350_v56 = vld [vmem:[%s3387_s13 + $0x18] sm:$0xff] }
 0x3fe   : > { %1635 = vmatpush.bf16.msrb.mxu3 %v2350_v56 }
 0x3ff   : > { %v1503_v59 = vadd.f32 %v1499_v57, %v1495_v58  ;;  %v2349_v57 = vld [vmem:[%s3387_s13 + $0x10] sm:$0xff]  ;;  %v2348_v58 = vld [vmem:[%s3387_s13 + $0x8] sm:$0xff] }
 0x401   : > { %v1507_v60 = vsel %vm1466_vm14, %v1503_v59, -inf }
 0x402   : > { %1508 = vmax.xlane.f32.xlu2 %v1507_v60  ;;  %1636 = vmatpush.bf16.msrb.mxu3 %v2349_v57 }
 0x404   : > { %v1487_v61 = vpop.f32.mrf.mxu1 }
 0x405   : > { %v1496_v63 = vmul.f32 0.25, %v1487_v61 }
 0x406   : > { %1637 = vmatpush.bf16.msrb.mxu3 %v2348_v58 }
 0x407   : > { %v1504_v0 = vadd.f32 %v1500_v62, %v1496_v63 }
 0x409   : > { %v1510_v1 = vsel %vm1466_vm14, %v1504_v0, -inf }
 0x40a   : > { %1511 = vmax.xlane.f32.xlu1 %v1510_v1 }
 0x40c   : > { %v1490_v2 = vpop.f32.mrf.mxu1 }
 0x40d   : > { %v1497_v5 = vmul.f32 0.25, %v1490_v2 }
 0x40f   : > { %v1505_v6 = vadd.f32 %v1501_v3, %v1497_v5 }
 0x411   : > { %v1513_v7 = vsel %vm1466_vm14, %v1505_v6, -inf }
 0x412   : > { %1514 = vmax.xlane.f32.xlu0 %v1513_v7 }
 0x414   : > { %v1492_v8 = vpop.f32.mrf.mxu1 }
 0x415   : > { %v1498_v10 = vmul.f32 0.25, %v1492_v8 }
 0x417   : > { %v1506_v11 = vadd.f32 %v1502_v9, %v1498_v10  ;;  %v2354_v9 = vld [vmem:[%s3344_s12 + $0x18] sm:$0xff] }
 0x418   : > { %v2358_v10 = vld [vmem:[%s3346_s16 + $0x18] sm:$0xff]  ;;  %1706 = vmatpush.bf16.msra.mxu0 %v2354_v9 }
 0x419   : > { %v1516_v12 = vsel %vm1466_vm14, %v1506_v11, -inf }
 0x41a   : > { %1517 = vmax.xlane.f32.xlu2 %v1516_v12  ;;  %v2357_v12 = vld [vmem:[%s3346_s16 + $0x10] sm:$0xff] }
 0x423   : > { %1460 = vrot.lane.b32.xlu1 %v1298_v14, %s2966_s27 }
 0x475   : > { %v1509_v15 = vpop.xlane.xlu2 %1508 }
 0x476   : > { %v1519_v16 = vsub.f32 %v1503_v59, %v1509_v15  ;;  %v2347_v59 = vld [vmem:[%s3387_s13] sm:$0xff]  ;;  %v2355_v15 = vld [vmem:[%s3346_s16] sm:$0xff] }
 0x477   : > { %1638 = vmatpush.bf16.msrb.mxu3 %v2347_v59 }
 0x478   : > { %v1523_v17 = vmul.f32 1.442695, %v1519_v16 }
 0x47a   : > { %2513 = vpow2.f32 %v1523_v17 }
 0x47b   : > { %1751 = vmatpush.bf16.msra.mxu3 %v2358_v10 }
 0x47d   : > { %v1512_v18 = vpop.xlane.xlu1 %1511 }
 0x47e   : > { %v1520_v19 = vsub.f32 %v1504_v0, %v1512_v18 }
 0x47f   : > { %1752 = vmatpush.bf16.msra.mxu3 %v2357_v12 }
 0x480   : > { %v2514_v20 = vpop.eup %2513  ;;  %v1525_v21 = vmul.f32 1.442695, %v1520_v19 }
 0x481   : > { %v1531_v22 = vsel %vm1466_vm14, %v2514_v20, 0.0 }
 0x482   : > { %2515 = vpow2.f32 %v1525_v21  ;;  %1532 = vadd.xlane.f32.xlu2 %v1531_v22 }
 0x483   : > { %1753 = vmatpush.bf16.msra.mxu3 %v2356_v13 }
 0x485   : > { %v1515_v23 = vpop.xlane.xlu0 %1514 }
 0x486   : > { %v1521_v24 = vsub.f32 %v1505_v6, %v1515_v23 }
 0x487   : > { %1754 = vmatpush.bf16.msra.mxu3 %v2355_v15 }
 0x488   : > { %v2516_v26 = vpop.eup %2515  ;;  %v1527_v27 = vmul.f32 1.442695, %v1521_v24 }
 0x489   : > { %v1534_v50 = vsel %vm1466_vm14, %v2516_v26, 0.0 }
 0x48a   : > { %2517 = vpow2.f32 %v1527_v27  ;;  %1535 = vadd.xlane.f32.xlu2 %v1534_v50 }
 0x48d   : > { %v1518_v28 = vpop.xlane.xlu2 %1517 }
 0x48e   : > { %v1522_v29 = vsub.f32 %v1506_v11, %v1518_v28  ;;  %v2353_v11 = vld [vmem:[%s3344_s12 + $0x10] sm:$0xff] }
 0x48f   : > { %1707 = vmatpush.bf16.msra.mxu0 %v2353_v11 }
 0x490   : > { %v2518_v30 = vpop.eup %2517  ;;  %v1529_v31 = vmul.f32 1.442695, %v1522_v29 }
 0x491   : > { %v1537_v32 = vsel %vm1466_vm14, %v2518_v30, 0.0 }
 0x492   : > { %2519 = vpow2.f32 %v1529_v31  ;;  %1538 = vadd.xlane.f32.xlu0 %v1537_v32  ;;  %v2361_v31 = vld [vmem:[%s3393_s23 + $0x10] sm:$0xff]  ;;  %v2360_v32 = vld [vmem:[%s3393_s23 + $0x8] sm:$0xff] }
 0x495   : > { %v1461_v33 = vpop.permute.xlu1 %1460 }
 0x496   : > { %v1553_v34 = vpack.c.bf16 %v1461_v33, %v1298_v14  ;;  %v2351_v14 = vld [vmem:[%s3344_s12] sm:$0xff] }
 0x497   : > { %v2359_v33 = vld [vmem:[%s3393_s23] sm:$0xff] }
 0x498   : > { %v2520_v35 = vpop.eup %2519  ;;  %1567 = vmatpush.bf16.msrb.mxu2 %v1553_v34 }
 0x499   : > { %v1540_v36 = vsel %vm1466_vm14, %v2520_v35, 0.0 }
 0x49a   : > { %1541 = vadd.xlane.f32.xlu2 %v1540_v36 }
 0x4f5   : > { %v1533_v37 = vpop.xlane.xlu2 %1532 }
 0x4f6   : > { %2521 = vrcp.f32 %v1533_v37 }
 0x4fc   : > { %v2522_v39 = vpop.eup %2521 }
 0x4fd   : > { %v1536_v38 = vpop.xlane.xlu2 %1535  ;;  %v1547_v41 = vmul.f32 %v2522_v39, %v2514_v20 }
 0x4fe   : > { %2523 = vrcp.f32 %v1536_v38 }
 0x504   : > { %v2524_v40 = vpop.eup %2523 }
 0x505   : > { %v1548_v42 = vmul.f32 %v2524_v40, %v2516_v26  ;;  %v1539_v44 = vpop.xlane.xlu0 %1538  ;;  %v2502_v26 = vld [vmem:[%s1107_s20] ss:$0 sm:$0xff] }
 0x506   : > { %2525 = vrcp.f32 %v1539_v44 }
 0x507   : > { %v1551_v43 = vpack.c.bf16 %v1548_v42, %v1547_v41 }
 0x509   : > { %2247 = vmatmul.msk.bf16.vlgmr.msrb.gmra.mxu2 %vm1466_vm14, %v1551_v43 }
 0x50c   : > { %v2526_v46 = vpop.eup %2525 }
 0x50d   : > { %v1542_v45 = vpop.xlane.xlu2 %1541  ;;  %v1549_v48 = vmul.f32 %v2526_v46, %v2518_v30  ;;  %v2362_v30 = vld [vmem:[%s3393_s23 + $0x18] sm:$0xff] }
 0x50e   : > { %2527 = vrcp.f32 %v1542_v45 }
 0x514   : > { %v2528_v47 = vpop.eup %2527 }
 0x515   : > { %v1550_v49 = vmul.f32 %v2528_v47, %v2520_v35 }
 0x517   : > { %v1552_v51 = vpack.c.bf16 %v1550_v49, %v1549_v48 }
 0x519   : > { %2248 = vmatmul.msk.bf16.gmra.mxu2 %vm1466_vm14, %v1552_v51 }
 0x58c   : > { %v1569_v52 = vpop.f32.mrf.mxu2 }
 0x594   : > { %v1571_v53 = vpop.f32.mrf.mxu2 }
 0x595   : > { %1580 = vrot.lane.b32.xlu0 %v1571_v53, %s2969_s4 }
 0x59c   : > { %v1574_v54 = vpop.f32.mrf.mxu2 }
 0x59d   : > { %1584 = vrot.lane.b32.xlu2 %v1574_v54, %s2970_s5 }
 0x5a4   : > { %v1576_v55 = vpop.f32.mrf.mxu2 }
 0x5a5   : > { %1588 = vrot.lane.b32.xlu1 %v1576_v55, %s2971_s24 }
 0x5f7   : > { %v1585_v62 = vpop.permute.xlu2 %1584 }
 0x607   : > { %v1581_v60 = vpop.permute.xlu0 %1580 }
 0x608   : > { %v1591_v61 = vsel %vm1466_vm14, %v1569_v52, %v1581_v60 }
 0x609   : > { %v1592_v63 = vsel %vm1325_vm6, %v1591_v61, %v1585_v62 }
 0x617   : > { %v1589_v0 = vpop.permute.xlu1 %1588 }
 0x618   : > { %v1594_v1 = vsel %vm1593_vm15, %v1592_v63, %v1589_v0 }
 0x619   : > { %v1603_v2 = vpack.c.bf16 %v1594_v1, %v1594_v1 }
 0x61b   : > { %2265 = vmatmul.msk.bf16.vlgmr.msrb.gmra.mxu3 %vm1122_vm1, %v1603_v2 }
 0x69e   : > { %v1640_v3 = vpop.f32.mrf.mxu3 }
 0x69f   : > { %v3512_v5 = vadd.f32 %v1640_v3, %v3400_v4  ;;  %v2352_v4 = vld [vmem:[%s3344_s12 + $0x8] sm:$0xff] }
 0x6a0   : > { %1708 = vmatpush.bf16.msra.mxu0 %v2352_v4 }
 0x6a1   : > { %1817 = vst.msk [vmem:[#allocation3] sm:$0xff] %vm1122_vm1, %v3512_v5  ;;  %v1645_v6 = vmul.f32 %v3512_v5, %v3512_v5 }
 0x6a3   : > { %v1646_v7 = vsel %vm1122_vm1, %v1645_v6, 0.0 }
 0x6a4   : > { %1647 = vadd.xlane.f32.xlu0 %v1646_v7  ;;  %1709 = vmatpush.bf16.msra.mxu0 %v2351_v14 }
 0x6a6   : > { %v1642_v8 = vpop.f32.mrf.mxu3 }
 0x6a8   : > { %1807 = vmatpush.bf16.msrb.mxu0 %v2362_v30 }
 0x6ac   : > { %1808 = vmatpush.bf16.msrb.mxu0 %v2361_v31 }
 0x6b0   : > { %1809 = vmatpush.bf16.msrb.mxu0 %v2360_v32 }
 0x6b4   : > { %1810 = vmatpush.bf16.msrb.mxu0 %v2359_v33 }
 0x717   : > { %v1648_v16 = vpop.xlane.xlu0 %1647 }
 0x718   : > { %v1649_v17 = vmul.f32 %v1648_v16, %v3417_v25 }
 0x71a   : > { %v1650_v18 = vadd.f32 1e-06, %v1649_v17 }
 0x71c   : > { %2529 = vrsqrt.f32 %v1650_v18  ;;  %vm1657_vm2 = vweird.f32 %v1650_v18 }
 0x722   : > { %v2530_v19 = vpop.eup %2529 }
 0x723   : > { %v1652_v20 = vmul.f32 %v2530_v19, %v1650_v18  ;;  %vm1658_vm0 = vweird.f32 %v2530_v19 }
 0x724   : > { %vm1659_vm3 = vmor %vm1657_vm2, %vm1658_vm0 }
 0x725   : > { %v1653_v21 = vmul.f32 %v2530_v19, %v1652_v20 }
 0x727   : > { %v1654_v22 = vmul.f32 0.5, %v1653_v21 }
 0x729   : > { %v1655_v23 = vsub.f32 1.5, %v1654_v22 }
 0x72b   : > { %v1656_v24 = vmul.f32 %v2530_v19, %v1655_v23 }
 0x72d   : > { %v1660_v27 = vsel %vm1659_vm3, %v2530_v19, %v1656_v24 }
 0x72e   : > { %v1661_v50 = vmul.f32 %v1660_v27, %v3512_v5 }
 0x730   : > { %v1665_v28 = vmul.f32 %v2502_v26, %v1661_v50 }
 0x732   : > { %v1666_v29 = vpack.c.bf16 %v1665_v28, %v1665_v28 }
 0x734   : > { %2282 = vmatmul.msk.bf16.vlgmr.msra.gmra.mxu0 %vm1122_vm1, %v1666_v29  ;;  %2299 = vmatmul.msk.bf16.vlgmr.msra.gmra.mxu3 %vm1122_vm1, %v1666_v29 }
 0x7b1   : > { %v1711_v34 = vpop.f32.mrf.mxu0 }
 0x7b2   : > { %v1760_v35 = vsub.f32 0.0, %v1711_v34 }
 0x7b4   : > { %v1761_v36 = vmul.f32 1.442695, %v1760_v35 }
 0x7b6   : > { %2531 = vpow2.f32 %v1761_v36 }
 0x7b7   : > { %v1756_v37 = vpop.f32.mrf.mxu3 }
 0x7b9   : > { %v1713_v38 = vpop.f32.mrf.mxu0 }
 0x7bc   : > { %v2532_v39 = vpop.eup %2531 }
 0x7bd   : > { %v1763_v40 = vadd.f32 1.0, %v2532_v39 }
 0x7bf   : > { %2533 = vrcp.f32 %v1763_v40  ;;  %v1758_v41 = vpop.f32.mrf.mxu3 }
 0x7c5   : > { %v2534_v42 = vpop.eup %2533 }
 0x7c6   : > { %v1765_v43 = vmul.f32 %v2534_v42, %v1711_v34 }
 0x7c8   : > { %v1766_v44 = vmul.f32 %v1765_v43, %v1756_v37 }
 0x7ca   : > { %v1775_v45 = vpack.c.bf16 %v1766_v44, %v1766_v44 }
 0x7cc   : > { %2316 = vmatmul.msk.bf16.vlgmr.msrb.gmra.mxu0 %vm1122_vm1, %v1775_v45 }
 0x849   : > { %v1812_v46 = vpop.f32.mrf.mxu0 }
 0x84a   : > { %1816 = vst.msk [vmem:[#allocation2] sm:$0xff] %vm1122_vm1, %v1812_v46 }
 0x84d   : > { %1821 = sbr.rel (%p2317_p3) target bundleno = 2278 (0x8e6), region = 164 }
 0x851   : > { %v1814_v47 = vpop.f32.mrf.mxu0 }
 0x852   : > { %v1822_v48 = vadd.f32 %v1812_v46, %v3512_v5  ;;  %v2535_v61 = vld [vmem:[#allocation12] ss:$0 sm:$0xff] }
 0x854   : > { %v1824_v49 = vmul.f32 %v1822_v48, %v1822_v48 }
 0x856   : > { %v1825_v51 = vsel %vm1122_vm1, %v1824_v49, 0.0 }
 0x857   : > { %1826 = vadd.xlane.f32.xlu0 %v1825_v51 }
 0x8ca   : > { %v1827_v52 = vpop.xlane.xlu0 %1826 }
 0x8cb   : > { %v1828_v53 = vmul.f32 %v1827_v52, %v3417_v25 }
 0x8cd   : > { %v1829_v54 = vadd.f32 1e-06, %v1828_v53 }
 0x8cf   : > { %2536 = vrsqrt.f32 %v1829_v54  ;;  %vm1836_vm5 = vweird.f32 %v1829_v54 }
 0x8d5   : > { %v2537_v55 = vpop.eup %2536 }
 0x8d6   : > { %v1831_v56 = vmul.f32 %v2537_v55, %v1829_v54  ;;  %vm1837_vm4 = vweird.f32 %v2537_v55 }
 0x8d7   : > { %vm1838_vm6 = vmor %vm1836_vm5, %vm1837_vm4 }
 0x8d8   : > { %v1832_v57 = vmul.f32 %v2537_v55, %v1831_v56 }
 0x8da   : > { %v1833_v58 = vmul.f32 0.5, %v1832_v57 }
 0x8dc   : > { %v1834_v59 = vsub.f32 1.5, %v1833_v58 }
 0x8de   : > { %v1835_v60 = vmul.f32 %v2537_v55, %v1834_v59 }
 0x8e0   : > { %v1839_v62 = vsel %vm1838_vm6, %v2537_v55, %v1835_v60 }
 0x8e1   : > { %v1840_v63 = vmul.f32 %v1839_v62, %v1822_v48 }
 0x8e3   : > { %v1844_v0 = vmul.f32 %v2535_v61, %v1840_v63 }
 0x8e5   : > { %1845 = vst.msk [vmem:[#allocation22] sm:$0xff] %vm1122_vm1, %v1844_v0 }
 0x8e6 PF: > { %p2445_p4 = scmp.eq.s32.totalorder %s3117_s6, 1  ;;  %s2972_s20 = smov [#allocation22]  }
 0x8e7   : > { %s1852_s25 = sshll.u32 %s2972_s20, 4  ;;  %s3663_s0 = sld [smem:[#allocation56_spill]]  ;;  %s1853_s25 = int_to_ptr.vmem [resolvable:$true] %s1852_s25 }
 0x8ed   : > { %s1854_s27 = sshll.u32 %s3663_s0, 4  ;;  %s1855_s27 = int_to_ptr.hbm [resolvable:$true] %s1854_s27 }
 0x8ee   : > { %2396 = dma.vmem_to_hbm [thread:$0]  (%p2445_p4), %s1853_s25, 128, %s1855_s27, [#allocation6]  }
 0x8ef   : > { %2937 = dma.done.wait (%p2445_p4), [#allocation6], 128  }
 0x8f0   : > { %2939 = vsyncadd (%p2445_p4), [#allocation6], 4294967168 }
 0x8f1 PF: > { %s3664_s25 = sld [smem:[#allocation31_spill]]  ;;  %s3667_s4 = smov %s2946_s30 }
 0x8f2   : > { %s3665_s21 = sld [smem:[#allocation30_spill]] }
 0x8f3   : > { %s3666_s24 = sld [smem:[#allocation32_spill]] }
 0x8f7   : > { %p43_p13 = scmp.ge.s32.totalorder %s3664_s25, 4  }
 0x8f8   : > { %s3668_s30 = smov %s3665_s21 }
 0x8f9   :  { %45 = sbr.rel (!%p43_p13) target bundleno = 35 (0x23), region = 261 }
 0x8fe   :  { %1868 = vsyncpa [#allocation5], 1 }
 0x8ff   :  { %1870 = vsyncpa [#allocation5 + $0x1], 1 }
 0x900   :  { %1871 = vsyncpa [#allocation8], 1 }
 0x901   :  { %1872 = vsyncpa [#allocation11], 1 }
 0x902   :  { %1873 = vsyncpa [#allocation14], 1 }
 0x903   :  { %1875 = vsyncpa [#allocation14 + $0x1], 1 }
 0x904   :  { %1876 = vsyncpa [#allocation17], 1 }
 0x905   :  { %1878 = vsyncpa [#allocation17 + $0x1], 1 }
 0x906   :  { %1879 = vsyncpa [#allocation20], 1 }
 0x907   :  { %1881 = vsyncpa [#allocation20 + $0x1], 1 }
 0x908   :  { %1882 = vsyncpa [#allocation6], 1 }
 0x909   :  { %1884 = vsyncpa [#allocation6 + $0x1], 1 }

</bundles_post_ra>
